<compile_context>
chip_gen: v7x
topology: tpu7x:2x2x1
jax: 0.10.0
libtpu: 0.0.40
codegen_flags: <defaults>
</compile_context>

<pallas_src>
import functools
import math

import jax
import jax.numpy as jnp
from jax.experimental import pallas as pl
from jax.experimental.pallas import tpu as pltpu


_LANE = 128  # TPU lane width: padded hidden width and per-Q/K/V block width.

CFG = dict(
    vocab_size=100,
    hidden=32,
    num_heads=4,
    num_layers=2,
    intermediate=64,
    max_pos=16,
    type_vocab=2,
    num_labels=2,
)


# ------------------------------- fused kernel ------------------------------- #

def _bert_stack_kernel(
    x_emb_ref, mask_ref, embg_ref, embb_ref,                    # constants
    wqkv_ref, bqkv_ref, wo_ref, bo_ref, ln1g_ref, ln1b_ref,     # per-layer (stacked)
    w1_ref, b1_ref, w2_ref, b2_ref, ln2g_ref, ln2b_ref,         # per-layer (stacked)
    wp_ref, bp_ref, wc_ref, bc_ref,                             # head
    out_ref,                                                    # (B, 128) logits (padded)
    x_scr,                                                      # VMEM (B*S, 128) resident activation
    *, batch, seq, hidden, num_heads, eps):
    layer = pl.program_id(0)
    n_layers = pl.num_programs(0)
    D = hidden // num_heads
    scale = 1.0 / math.sqrt(D)
    padh = x_scr.shape[1]

    # lane mask over the real hidden lanes (pad lanes of activations are exact zeros)
    lane = jax.lax.broadcasted_iota(jnp.int32, (1, padh), 1)
    lane_mask = (lane < hidden).astype(jnp.float32)

    def layer_norm(h, g, b):
        # two-pass LN over the REAL hidden lanes; pad lanes of h are 0 and g/b padding
        # is 0, so pad lanes of the result stay exactly 0.
        mean = jnp.sum(h, axis=-1, keepdims=True) * (1.0 / hidden)
        centered = (h - mean) * lane_mask
        var = jnp.sum(centered * centered, axis=-1, keepdims=True) * (1.0 / hidden)
        return centered * jax.lax.rsqrt(var + eps) * g + b

    # ---- embeddings LayerNorm, only on the first grid step ----------------- #
    @pl.when(layer == 0)
    def _embed_ln():
        x_scr[...] = layer_norm(x_emb_ref[...], embg_ref[...], embb_ref[...])

    # ---- encoder layer `layer` --------------------------------------------- #
    x = x_scr[...]                                   # (B*S, 128) f32, pad lanes zero
    xb = x.astype(jnp.bfloat16)

    # fused QKV projection: (B*S,128) x (128, 3*128) -> (B*S, 384)
    qkv = (jnp.dot(xb, wqkv_ref[...], preferred_element_type=jnp.float32)
           + bqkv_ref[...])
    mask3 = mask_ref[...]                            # (B, S, S) additive mask

    wo = wo_ref[...]                                 # (H, 128) bf16
    attn = jnp.zeros((batch * seq, padh), jnp.float32)
    for h in range(num_heads):                       # heads: short static loop; batch is batched
        q = qkv[:, h * D:(h + 1) * D].reshape(batch, seq, D).astype(jnp.bfloat16)
        k = qkv[:, _LANE + h * D:_LANE + (h + 1) * D].reshape(batch, seq, D).astype(jnp.bfloat16)
        v = qkv[:, 2 * _LANE + h * D:2 * _LANE + (h + 1) * D].reshape(batch, seq, D).astype(jnp.bfloat16)
        s = jnp.einsum("bqd,bkd->bqk", q, k,
                       preferred_element_type=jnp.float32) * scale + mask3
        s = s - jnp.max(s, axis=-1, keepdims=True)
        p = jnp.exp(s)
        p = p / jnp.sum(p, axis=-1, keepdims=True)   # exact softmax normalization
        ctx = jnp.einsum("bqk,bkd->bqd", p.astype(jnp.bfloat16), v,
                         preferred_element_type=jnp.float32)          # (B, S, D)
        ctx2 = ctx.reshape(batch * seq, D).astype(jnp.bfloat16)
        # per-head slice of the output projection also merges heads (no concat/transpose)
        attn = attn + jnp.dot(ctx2, wo[h * D:(h + 1) * D, :],
                              preferred_element_type=jnp.float32)     # (B*S, 128)
    attn = attn + bo_ref[...]

    # residual + LayerNorm 1
    h1 = x + attn
    h1n = layer_norm(h1, ln1g_ref[...], ln1b_ref[...])

    # FFN: in-proj + GELU + out-proj
    f = (jnp.dot(h1n.astype(jnp.bfloat16), w1_ref[...],
                 preferred_element_type=jnp.float32) + b1_ref[...])
    # TODO(synk): HF BERT uses exact erf-GELU; tanh approximation keeps the elementwise
    # path on well-supported Mosaic ops.  gelu(0) = 0, so pad lanes stay exactly zero.
    c = math.sqrt(2.0 / math.pi)
    f = 0.5 * f * (1.0 + jnp.tanh(c * (f + 0.044715 * f * f * f)))
    f2 = (jnp.dot(f.astype(jnp.bfloat16), w2_ref[...],
                  preferred_element_type=jnp.float32) + b2_ref[...])

    # residual + LayerNorm 2 -> resident activation for the next grid step
    h2 = h1n + f2
    x_new = layer_norm(h2, ln2g_ref[...], ln2b_ref[...])
    x_scr[...] = x_new

    # ---- pooler(tanh on [CLS]) + classifier, only on the last grid step ---- #
    @pl.when(layer == n_layers - 1)
    def _head():
        cls = jnp.concatenate(
            [x_new[b * seq:b * seq + 1, :] for b in range(batch)], axis=0)  # (B, 128)
        pooled = jnp.tanh(jnp.dot(cls.astype(jnp.bfloat16), wp_ref[...],
                                  preferred_element_type=jnp.float32) + bp_ref[...])
        out_ref[...] = (jnp.dot(pooled.astype(jnp.bfloat16), wc_ref[...],
                                preferred_element_type=jnp.float32) + bc_ref[...])


# ----------------------------- parameter packing ---------------------------- #

def _pad2(w, rows, cols):
    r, c = w.shape
    return jnp.zeros((rows, cols), w.dtype).at[:r, :c].set(w)


def init_params(key, cfg):
    H, I = cfg["hidden"], cfg["intermediate"]
    L = cfg["num_layers"]
    std = 0.02
    keys = iter(jax.random.split(key, 64))

    def dense(kin, kout):
        return (jax.random.normal(next(keys), (kin, kout), jnp.float32) * std,
                jnp.zeros((kout,), jnp.float32))

    def ln_gamma():
        return jnp.zeros((1, _LANE), jnp.float32).at[0, :H].set(1.0)

    params = {
        "word_emb": jax.random.normal(next(keys), (cfg["vocab_size"], H), jnp.float32) * std,
        "pos_emb": jax.random.normal(next(keys), (cfg["max_pos"], H), jnp.float32) * std,
        "type_emb": jax.random.normal(next(keys), (cfg["type_vocab"], H), jnp.float32) * std,
        "emb_ln_g": ln_gamma(),
        "emb_ln_b": jnp.zeros((1, _LANE), jnp.float32),
    }

    qkv_w, qkv_b, out_w, out_b = [], [], [], []
    ln1_g, ln1_b, ln2_g, ln2_b = [], [], [], []
    w1s, b1s, w2s, b2s = [], [], [], []
    for _ in range(L):
        wq, bq = dense(H, H)
        wk, bk = dense(H, H)
        wv, bv = dense(H, H)
        wo, bo = dense(H, H)
        w1, b1 = dense(H, I)
        w2, b2 = dense(I, H)

        # tight QKV packing: Q|K|V each one 128-lane block; heads contiguous inside.
        wqkv = jnp.zeros((_LANE, 3 * _LANE), jnp.float32)
        wqkv = wqkv.at[:H, 0 * _LANE:0 * _LANE + H].set(wq)
        wqkv = wqkv.at[:H, 1 * _LANE:1 * _LANE + H].set(wk)
        wqkv = wqkv.at[:H, 2 * _LANE:2 * _LANE + H].set(wv)
        bqkv = jnp.zeros((1, 3 * _LANE), jnp.float32)
        bqkv = bqkv.at[0, 0 * _LANE:0 * _LANE + H].set(bq)
        bqkv = bqkv.at[0, 1 * _LANE:1 * _LANE + H].set(bk)
        bqkv = bqkv.at[0, 2 * _LANE:2 * _LANE + H].set(bv)

        qkv_w.append(wqkv.astype(jnp.bfloat16))                          # (128, 384)
        qkv_b.append(bqkv)                                               # (1, 384)
        out_w.append(_pad2(wo, H, _LANE).astype(jnp.bfloat16))           # (32, 128)
        out_b.append(jnp.zeros((1, _LANE), jnp.float32).at[0, :H].set(bo))
        ln1_g.append(ln_gamma())
        ln1_b.append(jnp.zeros((1, _LANE), jnp.float32))
        w1s.append(_pad2(w1, _LANE, _LANE).astype(jnp.bfloat16))         # (128, 128)
        b1s.append(jnp.zeros((1, _LANE), jnp.float32).at[0, :I].set(b1))
        w2s.append(_pad2(w2, _LANE, _LANE).astype(jnp.bfloat16))         # (128, 128)
        b2s.append(jnp.zeros((1, _LANE), jnp.float32).at[0, :H].set(b2))
        ln2_g.append(ln_gamma())
        ln2_b.append(jnp.zeros((1, _LANE), jnp.float32))

    params.update(
        qkv_w=jnp.stack(qkv_w), qkv_b=jnp.stack(qkv_b),
        attn_out_w=jnp.stack(out_w), attn_out_b=jnp.stack(out_b),
        attn_ln_g=jnp.stack(ln1_g), attn_ln_b=jnp.stack(ln1_b),
        ffn_in_w=jnp.stack(w1s), ffn_in_b=jnp.stack(b1s),
        ffn_out_w=jnp.stack(w2s), ffn_out_b=jnp.stack(b2s),
        ffn_ln_g=jnp.stack(ln2_g), ffn_ln_b=jnp.stack(ln2_b),
    )

    wp, bp = dense(H, H)
    wc, bc = dense(H, cfg["num_labels"])
    params["pool_w"] = _pad2(wp, _LANE, _LANE).astype(jnp.bfloat16)
    params["pool_b"] = jnp.zeros((1, _LANE), jnp.float32).at[0, :H].set(bp)
    params["cls_w"] = _pad2(wc, _LANE, _LANE).astype(jnp.bfloat16)
    params["cls_b"] = jnp.zeros((1, _LANE), jnp.float32).at[0, :cfg["num_labels"]].set(bc)
    return params


# ------------------------------- forward pass -------------------------------- #

_LAYER_KEYS = ("qkv_w", "qkv_b", "attn_out_w", "attn_out_b",
               "attn_ln_g", "attn_ln_b",
               "ffn_in_w", "ffn_in_b", "ffn_out_w", "ffn_out_b",
               "ffn_ln_g", "ffn_ln_b")
_HEAD_KEYS = ("pool_w", "pool_b", "cls_w", "cls_b")


def _const_spec(shape):
    zeros = (0,) * len(shape)
    return pl.BlockSpec(tuple(shape), lambda i, _z=zeros: _z)


def _layer_spec(shape):
    # stacked (L, r, c): squeeze the layer axis; index_map selects layer i.
    return pl.BlockSpec((None,) + tuple(shape[1:]), lambda i: (i, 0, 0))


def adaptive_lr_model_forward(params, input_ids, attention_mask, cfg=CFG):
    """Equivalent of AdaptiveLRModel.forward -> classification logits (B, num_labels)."""
    B, S = input_ids.shape
    H = cfg["hidden"]
    L = cfg["num_layers"]

    # embeddings (gathers + adds stay as XLA glue), lane-padded to 128
    we = jnp.take(params["word_emb"], input_ids, axis=0)          # (B, S, H)
    pe = params["pos_emb"][:S][None, :, :]                        # (1, S, H)
    te = params["type_emb"][0][None, None, :]                     # token_type_ids = 0
    emb = (we + pe + te).reshape(B * S, H)
    x_emb = jnp.zeros((B * S, _LANE), jnp.float32).at[:, :H].set(emb)

    # additive attention mask, broadcast to (B, S, S) as in HF BERT: (1 - mask) * -10000
    add_mask = (1.0 - attention_mask.astype(jnp.float32)) * -10000.0
    mask3 = jnp.broadcast_to(add_mask[:, None, :], (B, S, S))

    operands = ((x_emb, mask3, params["emb_ln_g"], params["emb_ln_b"])
                + tuple(params[k] for k in _LAYER_KEYS)
                + tuple(params[k] for k in _HEAD_KEYS))
    in_specs = ([_const_spec(x_emb.shape), _const_spec(mask3.shape),
                 _const_spec(params["emb_ln_g"].shape), _const_spec(params["emb_ln_b"].shape)]
                + [_layer_spec(params[k].shape) for k in _LAYER_KEYS]
                + [_const_spec(params[k].shape) for k in _HEAD_KEYS])

    kern = functools.partial(_bert_stack_kernel, batch=B, seq=S, hidden=H,
                             num_heads=cfg["num_heads"], eps=1e-12)

    logits_pad = pl.pallas_call(
        kern,
        out_shape=jax.ShapeDtypeStruct((B, _LANE), jnp.float32),
        grid=(L,),
        in_specs=in_specs,
        out_specs=pl.BlockSpec((B, _LANE), lambda i: (0, 0)),
        scratch_shapes=[pltpu.VMEM((B * S, _LANE), jnp.float32)],   # resident activation
        compiler_params=pltpu.CompilerParams(
            dimension_semantics=("arbitrary",)),                     # layers are sequential
    )(*operands)

    return logits_pad[:, :cfg["num_labels"]]


# ---------------------------------- main ------------------------------------- #

if __name__ == "__main__":
    key = jax.random.PRNGKey(0)
    k_param, k_ids = jax.random.split(key)

    params = init_params(k_param, CFG)

    B, S = 2, 8
    input_ids = jax.random.randint(k_ids, (B, S), 0, CFG["vocab_size"], dtype=jnp.int32)
    # second example has two padding positions to exercise the attention mask
    attention_mask = jnp.array(
        [[1, 1, 1, 1, 1, 1, 1, 1],
         [1, 1, 1, 1, 1, 1, 0, 0]], dtype=jnp.int32)

    fwd = jax.jit(functools.partial(adaptive_lr_model_forward, cfg=CFG))
    logits = fwd(params, input_ids, attention_mask)
    jax.block_until_ready(logits)

    assert logits.shape == (B, CFG["num_labels"])
    assert bool(jnp.all(jnp.isfinite(logits)))
    print("KERNEL_OK")
</pallas_src>

<mosaic_0001>
module attributes {stable_mosaic.version = 11 : i64} {
  func.func @_bert_stack_kernel(%arg0: i32, %arg1: memref<16x128xf32, #tpu.memory_space<vmem>>, %arg2: memref<2x8x8xf32, #tpu.memory_space<vmem>>, %arg3: memref<1x128xf32, #tpu.memory_space<vmem>>, %arg4: memref<1x128xf32, #tpu.memory_space<vmem>>, %arg5: memref<1x128x384xbf16, #tpu.memory_space<vmem>>, %arg6: memref<1x1x384xf32, #tpu.memory_space<vmem>>, %arg7: memref<1x32x128xbf16, #tpu.memory_space<vmem>>, %arg8: memref<1x1x128xf32, #tpu.memory_space<vmem>>, %arg9: memref<1x1x128xf32, #tpu.memory_space<vmem>>, %arg10: memref<1x1x128xf32, #tpu.memory_space<vmem>>, %arg11: memref<1x128x128xbf16, #tpu.memory_space<vmem>>, %arg12: memref<1x1x128xf32, #tpu.memory_space<vmem>>, %arg13: memref<1x128x128xbf16, #tpu.memory_space<vmem>>, %arg14: memref<1x1x128xf32, #tpu.memory_space<vmem>>, %arg15: memref<1x1x128xf32, #tpu.memory_space<vmem>>, %arg16: memref<1x1x128xf32, #tpu.memory_space<vmem>>, %arg17: memref<128x128xbf16, #tpu.memory_space<vmem>>, %arg18: memref<1x128xf32, #tpu.memory_space<vmem>>, %arg19: memref<128x128xbf16, #tpu.memory_space<vmem>>, %arg20: memref<1x128xf32, #tpu.memory_space<vmem>>, %arg21: memref<2x128xf32, #tpu.memory_space<vmem>>, %arg22: memref<16x128xf32, #tpu.memory_space<vmem>>) attributes {dimension_semantics = [#tpu.dimension_semantics<arbitrary>], iteration_bounds = array<i64: 2>, scalar_prefetch = 0 : i64, scratch_operands = 1 : i64, tpu.core_type = #tpu.core_type<tc>, window_params = [{pipeline_mode = #tpu.pipeline_mode<synchronous>, transform_indices = @transform_0, window_bounds = array<i64: 16, 128>}, {pipeline_mode = #tpu.pipeline_mode<synchronous>, transform_indices = @transform_1, window_bounds = array<i64: 2, 8, 8>}, {pipeline_mode = #tpu.pipeline_mode<synchronous>, transform_indices = @transform_2, window_bounds = array<i64: 1, 128>}, {pipeline_mode = #tpu.pipeline_mode<synchronous>, transform_indices = @transform_3, window_bounds = array<i64: 1, 128>}, {transform_indices = @transform_4, window_bounds = array<i64: 1, 128, 384>}, {transform_indices = @transform_5, window_bounds = array<i64: 1, 1, 384>}, {transform_indices = @transform_6, window_bounds = array<i64: 1, 32, 128>}, {transform_indices = @transform_7, window_bounds = array<i64: 1, 1, 128>}, {transform_indices = @transform_8, window_bounds = array<i64: 1, 1, 128>}, {transform_indices = @transform_9, window_bounds = array<i64: 1, 1, 128>}, {transform_indices = @transform_10, window_bounds = array<i64: 1, 128, 128>}, {transform_indices = @transform_11, window_bounds = array<i64: 1, 1, 128>}, {transform_indices = @transform_12, window_bounds = array<i64: 1, 128, 128>}, {transform_indices = @transform_13, window_bounds = array<i64: 1, 1, 128>}, {transform_indices = @transform_14, window_bounds = array<i64: 1, 1, 128>}, {transform_indices = @transform_15, window_bounds = array<i64: 1, 1, 128>}, {pipeline_mode = #tpu.pipeline_mode<synchronous>, transform_indices = @transform_16, window_bounds = array<i64: 128, 128>}, {pipeline_mode = #tpu.pipeline_mode<synchronous>, transform_indices = @transform_17, window_bounds = array<i64: 1, 128>}, {pipeline_mode = #tpu.pipeline_mode<synchronous>, transform_indices = @transform_18, window_bounds = array<i64: 128, 128>}, {pipeline_mode = #tpu.pipeline_mode<synchronous>, transform_indices = @transform_19, window_bounds = array<i64: 1, 128>}, {pipeline_mode = #tpu.pipeline_mode<synchronous>, transform_indices = @transform_20, window_bounds = array<i64: 2, 128>}]} {
    %0 = tpu.iota {dimensions = array<i32: 1>} : vector<1x128xi32>
    %c32_i32 = arith.constant 32 : i32
    %1 = vector.broadcast %c32_i32 : i32 to vector<1x128xi32>
    %2 = arith.cmpi slt, %0, %1 : vector<1x128xi32>
    %3 = arith.extui %2 : vector<1x128xi1> to vector<1x128xi32>
    %4 = arith.sitofp %3 : vector<1x128xi32> to vector<1x128xf32>
    %c0_i32 = arith.constant 0 : i32
    %5 = arith.cmpi eq, %arg0, %c0_i32 : i32
    %6 = arith.extui %5 : i1 to i32
    %c0_i32_0 = arith.constant 0 : i32
    %7 = arith.cmpi ne, %6, %c0_i32_0 : i32
    scf.if %7 {
      %c0_85 = arith.constant 0 : index
      %c0_86 = arith.constant 0 : index
      %228 = vector.load %arg1[%c0_85, %c0_86] : memref<16x128xf32, #tpu.memory_space<vmem>>, vector<16x128xf32>
      %c0_87 = arith.constant 0 : index
      %c0_88 = arith.constant 0 : index
      %229 = vector.load %arg3[%c0_87, %c0_88] : memref<1x128xf32, #tpu.memory_space<vmem>>, vector<1x128xf32>
      %c0_89 = arith.constant 0 : index
      %c0_90 = arith.constant 0 : index
      %230 = vector.load %arg4[%c0_89, %c0_90] : memref<1x128xf32, #tpu.memory_space<vmem>>, vector<1x128xf32>
      %cst_91 = arith.constant dense<0.000000e+00> : vector<16xf32>
      %231 = vector.multi_reduction <add>, %228, %cst_91 [1] : vector<16x128xf32> to vector<16xf32>
      %232 = vector.shape_cast %231 : vector<16xf32> to vector<16x1xf32>
      %cst_92 = arith.constant 3.125000e-02 : f32
      %233 = vector.broadcast %cst_92 : f32 to vector<16x1xf32>
      %234 = arith.mulf %232, %233 : vector<16x1xf32>
      %235 = vector.broadcast %234 : vector<16x1xf32> to vector<16x128xf32>
      %236 = arith.subf %228, %235 : vector<16x128xf32>
      %237 = vector.broadcast %4 : vector<1x128xf32> to vector<16x128xf32>
      %238 = arith.mulf %236, %237 : vector<16x128xf32>
      %239 = arith.mulf %238, %238 : vector<16x128xf32>
      %cst_93 = arith.constant dense<0.000000e+00> : vector<16xf32>
      %240 = vector.multi_reduction <add>, %239, %cst_93 [1] : vector<16x128xf32> to vector<16xf32>
      %241 = vector.shape_cast %240 : vector<16xf32> to vector<16x1xf32>
      %cst_94 = arith.constant 3.125000e-02 : f32
      %242 = vector.broadcast %cst_94 : f32 to vector<16x1xf32>
      %243 = arith.mulf %241, %242 : vector<16x1xf32>
      %cst_95 = arith.constant 9.99999996E-13 : f32
      %244 = vector.broadcast %cst_95 : f32 to vector<16x1xf32>
      %245 = arith.addf %243, %244 : vector<16x1xf32>
      %246 = math.rsqrt %245 : vector<16x1xf32>
      %247 = vector.broadcast %246 : vector<16x1xf32> to vector<16x128xf32>
      %248 = arith.mulf %238, %247 : vector<16x128xf32>
      %249 = vector.broadcast %229 : vector<1x128xf32> to vector<16x128xf32>
      %250 = arith.mulf %248, %249 : vector<16x128xf32>
      %251 = vector.broadcast %230 : vector<1x128xf32> to vector<16x128xf32>
      %252 = arith.addf %250, %251 : vector<16x128xf32>
      %c0_96 = arith.constant 0 : index
      %c0_97 = arith.constant 0 : index
      %253 = vector.load %arg22[%c0_96, %c0_97] : memref<16x128xf32, #tpu.memory_space<vmem>>, vector<16x128xf32>
      tpu.vector_store %arg22[%c0_96, %c0_97], %252 {strides = array<i32>} : memref<16x128xf32, #tpu.memory_space<vmem>>, vector<16x128xf32>,
    } else {
    }
    %c0 = arith.constant 0 : index
    %c0_1 = arith.constant 0 : index
    %8 = vector.load %arg22[%c0, %c0_1] : memref<16x128xf32, #tpu.memory_space<vmem>>, vector<16x128xf32>
    %9 = arith.truncf %8 : vector<16x128xf32> to vector<16x128xbf16>
    %c0_2 = arith.constant 0 : index
    %c0_3 = arith.constant 0 : index
    %c0_4 = arith.constant 0 : index
    %10 = vector.load %arg5[%c0_2, %c0_3, %c0_4] : memref<1x128x384xbf16, #tpu.memory_space<vmem>>, vector<1x128x384xbf16>
    %11 = vector.shape_cast %10 : vector<1x128x384xbf16> to vector<128x384xbf16>
    %cst = arith.constant dense<0.000000e+00> : vector<16x384xf32>
    %12 = tpu.matmul %9, %11, %cst {dimension_numbers = #tpu.dot_dimension_numbers<[1], [0], [0], [1], [0, 0, 1, 1], [], []>} : vector<16x128xbf16>, vector<128x384xbf16>, vector<16x384xf32> -> vector<16x384xf32>
    %c0_5 = arith.constant 0 : index
    %c0_6 = arith.constant 0 : index
    %c0_7 = arith.constant 0 : index
    %13 = vector.load %arg6[%c0_5, %c0_6, %c0_7] : memref<1x1x384xf32, #tpu.memory_space<vmem>>, vector<1x1x384xf32>
    %14 = vector.shape_cast %13 : vector<1x1x384xf32> to vector<1x384xf32>
    %15 = vector.broadcast %14 : vector<1x384xf32> to vector<16x384xf32>
    %16 = arith.addf %12, %15 : vector<16x384xf32>
    %c0_8 = arith.constant 0 : index
    %c0_9 = arith.constant 0 : index
    %c0_10 = arith.constant 0 : index
    %17 = vector.load %arg2[%c0_8, %c0_9, %c0_10] : memref<2x8x8xf32, #tpu.memory_space<vmem>>, vector<2x8x8xf32>
    %c0_11 = arith.constant 0 : index
    %c0_12 = arith.constant 0 : index
    %c0_13 = arith.constant 0 : index
    %18 = vector.load %arg7[%c0_11, %c0_12, %c0_13] : memref<1x32x128xbf16, #tpu.memory_space<vmem>>, vector<1x32x128xbf16>
    %19 = vector.shape_cast %18 : vector<1x32x128xbf16> to vector<32x128xbf16>
    %cst_14 = arith.constant 0.000000e+00 : f32
    %20 = vector.broadcast %cst_14 : f32 to vector<16x128xf32>
    %21 = vector.extract_strided_slice %16 {offsets = [0, 0], sizes = [16, 8], strides = [1, 1]} : vector<16x384xf32> to vector<16x8xf32>
    %22 = vector.shape_cast %21 : vector<16x8xf32> to vector<2x8x8xf32>
    %23 = arith.truncf %22 : vector<2x8x8xf32> to vector<2x8x8xbf16>
    %24 = vector.extract_strided_slice %16 {offsets = [0, 128], sizes = [16, 8], strides = [1, 1]} : vector<16x384xf32> to vector<16x8xf32>
    %25 = vector.shape_cast %24 : vector<16x8xf32> to vector<2x8x8xf32>
    %26 = arith.truncf %25 : vector<2x8x8xf32> to vector<2x8x8xbf16>
    %27 = vector.extract_strided_slice %16 {offsets = [0, 256], sizes = [16, 8], strides = [1, 1]} : vector<16x384xf32> to vector<16x8xf32>
    %28 = vector.shape_cast %27 : vector<16x8xf32> to vector<2x8x8xf32>
    %29 = arith.truncf %28 : vector<2x8x8xf32> to vector<2x8x8xbf16>
    "tpu.trace_start"() <{level = 10 : i32, message = "bqd,bkd->bqk"}> : () -> ()
    %cst_15 = arith.constant dense<0.000000e+00> : vector<2x8x8xf32>
    %30 = tpu.matmul %23, %26, %cst_15 {dimension_numbers = #tpu.dot_dimension_numbers<[2], [2], [1], [1], [0, 0, 0, 1, 1, 1], [0], [0]>} : vector<2x8x8xbf16>, vector<2x8x8xbf16>, vector<2x8x8xf32> -> vector<2x8x8xf32>
    "tpu.trace_stop"() : () -> ()
    %cst_16 = arith.constant 0.353553385 : f32
    %31 = vector.broadcast %cst_16 : f32 to vector<2x8x8xf32>
    %32 = arith.mulf %30, %31 : vector<2x8x8xf32>
    %33 = arith.addf %32, %17 : vector<2x8x8xf32>
    %cst_17 = arith.constant dense<0xFF800000> : vector<2x8xf32>
    %34 = vector.multi_reduction <maximumf>, %33, %cst_17 [2] : vector<2x8x8xf32> to vector<2x8xf32>
    %35 = vector.shape_cast %34 : vector<2x8xf32> to vector<2x8x1xf32>
    %36 = vector.broadcast %35 : vector<2x8x1xf32> to vector<2x8x8xf32>
    %37 = arith.subf %33, %36 : vector<2x8x8xf32>
    %38 = math.exp %37 : vector<2x8x8xf32>
    %cst_18 = arith.constant dense<0.000000e+00> : vector<2x8xf32>
    %39 = vector.multi_reduction <add>, %38, %cst_18 [2] : vector<2x8x8xf32> to vector<2x8xf32>
    %40 = vector.shape_cast %39 : vector<2x8xf32> to vector<2x8x1xf32>
    %41 = vector.broadcast %40 : vector<2x8x1xf32> to vector<2x8x8xf32>
    %42 = arith.divf %38, %41 : vector<2x8x8xf32>
    %43 = arith.truncf %42 : vector<2x8x8xf32> to vector<2x8x8xbf16>
    "tpu.trace_start"() <{level = 10 : i32, message = "bqk,bkd->bqd"}> : () -> ()
    %cst_19 = arith.constant dense<0.000000e+00> : vector<2x8x8xf32>
    %44 = tpu.matmul %43, %29, %cst_19 {dimension_numbers = #tpu.dot_dimension_numbers<[2], [1], [1], [2], [0, 0, 0, 1, 1, 2], [0], [0]>} : vector<2x8x8xbf16>, vector<2x8x8xbf16>, vector<2x8x8xf32> -> vector<2x8x8xf32>
    "tpu.trace_stop"() : () -> ()
    %45 = vector.shape_cast %44 : vector<2x8x8xf32> to vector<16x8xf32>
    %46 = arith.truncf %45 : vector<16x8xf32> to vector<16x8xbf16>
    %47 = vector.extract_strided_slice %19 {offsets = [0, 0], sizes = [8, 128], strides = [1, 1]} : vector<32x128xbf16> to vector<8x128xbf16>
    %cst_20 = arith.constant dense<0.000000e+00> : vector<16x128xf32>
    %48 = tpu.matmul %46, %47, %cst_20 {dimension_numbers = #tpu.dot_dimension_numbers<[1], [0], [0], [1], [0, 0, 1, 1], [], []>} : vector<16x8xbf16>, vector<8x128xbf16>, vector<16x128xf32> -> vector<16x128xf32>
    %49 = arith.addf %20, %48 : vector<16x128xf32>
    %50 = vector.extract_strided_slice %16 {offsets = [0, 8], sizes = [16, 8], strides = [1, 1]} : vector<16x384xf32> to vector<16x8xf32>
    %51 = vector.shape_cast %50 : vector<16x8xf32> to vector<2x8x8xf32>
    %52 = arith.truncf %51 : vector<2x8x8xf32> to vector<2x8x8xbf16>
    %53 = vector.extract_strided_slice %16 {offsets = [0, 136], sizes = [16, 8], strides = [1, 1]} : vector<16x384xf32> to vector<16x8xf32>
    %54 = vector.shape_cast %53 : vector<16x8xf32> to vector<2x8x8xf32>
    %55 = arith.truncf %54 : vector<2x8x8xf32> to vector<2x8x8xbf16>
    %56 = vector.extract_strided_slice %16 {offsets = [0, 264], sizes = [16, 8], strides = [1, 1]} : vector<16x384xf32> to vector<16x8xf32>
    %57 = vector.shape_cast %56 : vector<16x8xf32> to vector<2x8x8xf32>
    %58 = arith.truncf %57 : vector<2x8x8xf32> to vector<2x8x8xbf16>
    "tpu.trace_start"() <{level = 10 : i32, message = "bqd,bkd->bqk"}> : () -> ()
    %cst_21 = arith.constant dense<0.000000e+00> : vector<2x8x8xf32>
    %59 = tpu.matmul %52, %55, %cst_21 {dimension_numbers = #tpu.dot_dimension_numbers<[2], [2], [1], [1], [0, 0, 0, 1, 1, 1], [0], [0]>} : vector<2x8x8xbf16>, vector<2x8x8xbf16>, vector<2x8x8xf32> -> vector<2x8x8xf32>
    "tpu.trace_stop"() : () -> ()
    %cst_22 = arith.constant 0.353553385 : f32
    %60 = vector.broadcast %cst_22 : f32 to vector<2x8x8xf32>
    %61 = arith.mulf %59, %60 : vector<2x8x8xf32>
    %62 = arith.addf %61, %17 : vector<2x8x8xf32>
    %cst_23 = arith.constant dense<0xFF800000> : vector<2x8xf32>
    %63 = vector.multi_reduction <maximumf>, %62, %cst_23 [2] : vector<2x8x8xf32> to vector<2x8xf32>
    %64 = vector.shape_cast %63 : vector<2x8xf32> to vector<2x8x1xf32>
    %65 = vector.broadcast %64 : vector<2x8x1xf32> to vector<2x8x8xf32>
    %66 = arith.subf %62, %65 : vector<2x8x8xf32>
    %67 = math.exp %66 : vector<2x8x8xf32>
    %cst_24 = arith.constant dense<0.000000e+00> : vector<2x8xf32>
    %68 = vector.multi_reduction <add>, %67, %cst_24 [2] : vector<2x8x8xf32> to vector<2x8xf32>
    %69 = vector.shape_cast %68 : vector<2x8xf32> to vector<2x8x1xf32>
    %70 = vector.broadcast %69 : vector<2x8x1xf32> to vector<2x8x8xf32>
    %71 = arith.divf %67, %70 : vector<2x8x8xf32>
    %72 = arith.truncf %71 : vector<2x8x8xf32> to vector<2x8x8xbf16>
    "tpu.trace_start"() <{level = 10 : i32, message = "bqk,bkd->bqd"}> : () -> ()
    %cst_25 = arith.constant dense<0.000000e+00> : vector<2x8x8xf32>
    %73 = tpu.matmul %72, %58, %cst_25 {dimension_numbers = #tpu.dot_dimension_numbers<[2], [1], [1], [2], [0, 0, 0, 1, 1, 2], [0], [0]>} : vector<2x8x8xbf16>, vector<2x8x8xbf16>, vector<2x8x8xf32> -> vector<2x8x8xf32>
    "tpu.trace_stop"() : () -> ()
    %74 = vector.shape_cast %73 : vector<2x8x8xf32> to vector<16x8xf32>
    %75 = arith.truncf %74 : vector<16x8xf32> to vector<16x8xbf16>
    %76 = vector.extract_strided_slice %19 {offsets = [8, 0], sizes = [8, 128], strides = [1, 1]} : vector<32x128xbf16> to vector<8x128xbf16>
    %cst_26 = arith.constant dense<0.000000e+00> : vector<16x128xf32>
    %77 = tpu.matmul %75, %76, %cst_26 {dimension_numbers = #tpu.dot_dimension_numbers<[1], [0], [0], [1], [0, 0, 1, 1], [], []>} : vector<16x8xbf16>, vector<8x128xbf16>, vector<16x128xf32> -> vector<16x128xf32>
    %78 = arith.addf %49, %77 : vector<16x128xf32>
    %79 = vector.extract_strided_slice %16 {offsets = [0, 16], sizes = [16, 8], strides = [1, 1]} : vector<16x384xf32> to vector<16x8xf32>
    %80 = vector.shape_cast %79 : vector<16x8xf32> to vector<2x8x8xf32>
    %81 = arith.truncf %80 : vector<2x8x8xf32> to vector<2x8x8xbf16>
    %82 = vector.extract_strided_slice %16 {offsets = [0, 144], sizes = [16, 8], strides = [1, 1]} : vector<16x384xf32> to vector<16x8xf32>
    %83 = vector.shape_cast %82 : vector<16x8xf32> to vector<2x8x8xf32>
    %84 = arith.truncf %83 : vector<2x8x8xf32> to vector<2x8x8xbf16>
    %85 = vector.extract_strided_slice %16 {offsets = [0, 272], sizes = [16, 8], strides = [1, 1]} : vector<16x384xf32> to vector<16x8xf32>
    %86 = vector.shape_cast %85 : vector<16x8xf32> to vector<2x8x8xf32>
    %87 = arith.truncf %86 : vector<2x8x8xf32> to vector<2x8x8xbf16>
    "tpu.trace_start"() <{level = 10 : i32, message = "bqd,bkd->bqk"}> : () -> ()
    %cst_27 = arith.constant dense<0.000000e+00> : vector<2x8x8xf32>
    %88 = tpu.matmul %81, %84, %cst_27 {dimension_numbers = #tpu.dot_dimension_numbers<[2], [2], [1], [1], [0, 0, 0, 1, 1, 1], [0], [0]>} : vector<2x8x8xbf16>, vector<2x8x8xbf16>, vector<2x8x8xf32> -> vector<2x8x8xf32>
    "tpu.trace_stop"() : () -> ()
    %cst_28 = arith.constant 0.353553385 : f32
    %89 = vector.broadcast %cst_28 : f32 to vector<2x8x8xf32>
    %90 = arith.mulf %88, %89 : vector<2x8x8xf32>
    %91 = arith.addf %90, %17 : vector<2x8x8xf32>
    %cst_29 = arith.constant dense<0xFF800000> : vector<2x8xf32>
    %92 = vector.multi_reduction <maximumf>, %91, %cst_29 [2] : vector<2x8x8xf32> to vector<2x8xf32>
    %93 = vector.shape_cast %92 : vector<2x8xf32> to vector<2x8x1xf32>
    %94 = vector.broadcast %93 : vector<2x8x1xf32> to vector<2x8x8xf32>
    %95 = arith.subf %91, %94 : vector<2x8x8xf32>
    %96 = math.exp %95 : vector<2x8x8xf32>
    %cst_30 = arith.constant dense<0.000000e+00> : vector<2x8xf32>
    %97 = vector.multi_reduction <add>, %96, %cst_30 [2] : vector<2x8x8xf32> to vector<2x8xf32>
    %98 = vector.shape_cast %97 : vector<2x8xf32> to vector<2x8x1xf32>
    %99 = vector.broadcast %98 : vector<2x8x1xf32> to vector<2x8x8xf32>
    %100 = arith.divf %96, %99 : vector<2x8x8xf32>
    %101 = arith.truncf %100 : vector<2x8x8xf32> to vector<2x8x8xbf16>
    "tpu.trace_start"() <{level = 10 : i32, message = "bqk,bkd->bqd"}> : () -> ()
    %cst_31 = arith.constant dense<0.000000e+00> : vector<2x8x8xf32>
    %102 = tpu.matmul %101, %87, %cst_31 {dimension_numbers = #tpu.dot_dimension_numbers<[2], [1], [1], [2], [0, 0, 0, 1, 1, 2], [0], [0]>} : vector<2x8x8xbf16>, vector<2x8x8xbf16>, vector<2x8x8xf32> -> vector<2x8x8xf32>
    "tpu.trace_stop"() : () -> ()
    %103 = vector.shape_cast %102 : vector<2x8x8xf32> to vector<16x8xf32>
    %104 = arith.truncf %103 : vector<16x8xf32> to vector<16x8xbf16>
    %105 = vector.extract_strided_slice %19 {offsets = [16, 0], sizes = [8, 128], strides = [1, 1]} : vector<32x128xbf16> to vector<8x128xbf16>
    %cst_32 = arith.constant dense<0.000000e+00> : vector<16x128xf32>
    %106 = tpu.matmul %104, %105, %cst_32 {dimension_numbers = #tpu.dot_dimension_numbers<[1], [0], [0], [1], [0, 0, 1, 1], [], []>} : vector<16x8xbf16>, vector<8x128xbf16>, vector<16x128xf32> -> vector<16x128xf32>
    %107 = arith.addf %78, %106 : vector<16x128xf32>
    %108 = vector.extract_strided_slice %16 {offsets = [0, 24], sizes = [16, 8], strides = [1, 1]} : vector<16x384xf32> to vector<16x8xf32>
    %109 = vector.shape_cast %108 : vector<16x8xf32> to vector<2x8x8xf32>
    %110 = arith.truncf %109 : vector<2x8x8xf32> to vector<2x8x8xbf16>
    %111 = vector.extract_strided_slice %16 {offsets = [0, 152], sizes = [16, 8], strides = [1, 1]} : vector<16x384xf32> to vector<16x8xf32>
    %112 = vector.shape_cast %111 : vector<16x8xf32> to vector<2x8x8xf32>
    %113 = arith.truncf %112 : vector<2x8x8xf32> to vector<2x8x8xbf16>
    %114 = vector.extract_strided_slice %16 {offsets = [0, 280], sizes = [16, 8], strides = [1, 1]} : vector<16x384xf32> to vector<16x8xf32>
    %115 = vector.shape_cast %114 : vector<16x8xf32> to vector<2x8x8xf32>
    %116 = arith.truncf %115 : vector<2x8x8xf32> to vector<2x8x8xbf16>
    "tpu.trace_start"() <{level = 10 : i32, message = "bqd,bkd->bqk"}> : () -> ()
    %cst_33 = arith.constant dense<0.000000e+00> : vector<2x8x8xf32>
    %117 = tpu.matmul %110, %113, %cst_33 {dimension_numbers = #tpu.dot_dimension_numbers<[2], [2], [1], [1], [0, 0, 0, 1, 1, 1], [0], [0]>} : vector<2x8x8xbf16>, vector<2x8x8xbf16>, vector<2x8x8xf32> -> vector<2x8x8xf32>
    "tpu.trace_stop"() : () -> ()
    %cst_34 = arith.constant 0.353553385 : f32
    %118 = vector.broadcast %cst_34 : f32 to vector<2x8x8xf32>
    %119 = arith.mulf %117, %118 : vector<2x8x8xf32>
    %120 = arith.addf %119, %17 : vector<2x8x8xf32>
    %cst_35 = arith.constant dense<0xFF800000> : vector<2x8xf32>
    %121 = vector.multi_reduction <maximumf>, %120, %cst_35 [2] : vector<2x8x8xf32> to vector<2x8xf32>
    %122 = vector.shape_cast %121 : vector<2x8xf32> to vector<2x8x1xf32>
    %123 = vector.broadcast %122 : vector<2x8x1xf32> to vector<2x8x8xf32>
    %124 = arith.subf %120, %123 : vector<2x8x8xf32>
    %125 = math.exp %124 : vector<2x8x8xf32>
    %cst_36 = arith.constant dense<0.000000e+00> : vector<2x8xf32>
    %126 = vector.multi_reduction <add>, %125, %cst_36 [2] : vector<2x8x8xf32> to vector<2x8xf32>
    %127 = vector.shape_cast %126 : vector<2x8xf32> to vector<2x8x1xf32>
    %128 = vector.broadcast %127 : vector<2x8x1xf32> to vector<2x8x8xf32>
    %129 = arith.divf %125, %128 : vector<2x8x8xf32>
    %130 = arith.truncf %129 : vector<2x8x8xf32> to vector<2x8x8xbf16>
    "tpu.trace_start"() <{level = 10 : i32, message = "bqk,bkd->bqd"}> : () -> ()
    %cst_37 = arith.constant dense<0.000000e+00> : vector<2x8x8xf32>
    %131 = tpu.matmul %130, %116, %cst_37 {dimension_numbers = #tpu.dot_dimension_numbers<[2], [1], [1], [2], [0, 0, 0, 1, 1, 2], [0], [0]>} : vector<2x8x8xbf16>, vector<2x8x8xbf16>, vector<2x8x8xf32> -> vector<2x8x8xf32>
    "tpu.trace_stop"() : () -> ()
    %132 = vector.shape_cast %131 : vector<2x8x8xf32> to vector<16x8xf32>
    %133 = arith.truncf %132 : vector<16x8xf32> to vector<16x8xbf16>
    %134 = vector.extract_strided_slice %19 {offsets = [24, 0], sizes = [8, 128], strides = [1, 1]} : vector<32x128xbf16> to vector<8x128xbf16>
    %cst_38 = arith.constant dense<0.000000e+00> : vector<16x128xf32>
    %135 = tpu.matmul %133, %134, %cst_38 {dimension_numbers = #tpu.dot_dimension_numbers<[1], [0], [0], [1], [0, 0, 1, 1], [], []>} : vector<16x8xbf16>, vector<8x128xbf16>, vector<16x128xf32> -> vector<16x128xf32>
    %136 = arith.addf %107, %135 : vector<16x128xf32>
    %c0_39 = arith.constant 0 : index
    %c0_40 = arith.constant 0 : index
    %c0_41 = arith.constant 0 : index
    %137 = vector.load %arg8[%c0_39, %c0_40, %c0_41] : memref<1x1x128xf32, #tpu.memory_space<vmem>>, vector<1x1x128xf32>
    %138 = vector.shape_cast %137 : vector<1x1x128xf32> to vector<1x128xf32>
    %139 = vector.broadcast %138 : vector<1x128xf32> to vector<16x128xf32>
    %140 = arith.addf %136, %139 : vector<16x128xf32>
    %141 = arith.addf %8, %140 : vector<16x128xf32>
    %c0_42 = arith.constant 0 : index
    %c0_43 = arith.constant 0 : index
    %c0_44 = arith.constant 0 : index
    %142 = vector.load %arg9[%c0_42, %c0_43, %c0_44] : memref<1x1x128xf32, #tpu.memory_space<vmem>>, vector<1x1x128xf32>
    %143 = vector.shape_cast %142 : vector<1x1x128xf32> to vector<1x128xf32>
    %c0_45 = arith.constant 0 : index
    %c0_46 = arith.constant 0 : index
    %c0_47 = arith.constant 0 : index
    %144 = vector.load %arg10[%c0_45, %c0_46, %c0_47] : memref<1x1x128xf32, #tpu.memory_space<vmem>>, vector<1x1x128xf32>
    %145 = vector.shape_cast %144 : vector<1x1x128xf32> to vector<1x128xf32>
    %cst_48 = arith.constant dense<0.000000e+00> : vector<16xf32>
    %146 = vector.multi_reduction <add>, %141, %cst_48 [1] : vector<16x128xf32> to vector<16xf32>
    %147 = vector.shape_cast %146 : vector<16xf32> to vector<16x1xf32>
    %cst_49 = arith.constant 3.125000e-02 : f32
    %148 = vector.broadcast %cst_49 : f32 to vector<16x1xf32>
    %149 = arith.mulf %147, %148 : vector<16x1xf32>
    %150 = vector.broadcast %149 : vector<16x1xf32> to vector<16x128xf32>
    %151 = arith.subf %141, %150 : vector<16x128xf32>
    %152 = vector.broadcast %4 : vector<1x128xf32> to vector<16x128xf32>
    %153 = arith.mulf %151, %152 : vector<16x128xf32>
    %154 = arith.mulf %153, %153 : vector<16x128xf32>
    %cst_50 = arith.constant dense<0.000000e+00> : vector<16xf32>
    %155 = vector.multi_reduction <add>, %154, %cst_50 [1] : vector<16x128xf32> to vector<16xf32>
    %156 = vector.shape_cast %155 : vector<16xf32> to vector<16x1xf32>
    %cst_51 = arith.constant 3.125000e-02 : f32
    %157 = vector.broadcast %cst_51 : f32 to vector<16x1xf32>
    %158 = arith.mulf %156, %157 : vector<16x1xf32>
    %cst_52 = arith.constant 9.99999996E-13 : f32
    %159 = vector.broadcast %cst_52 : f32 to vector<16x1xf32>
    %160 = arith.addf %158, %159 : vector<16x1xf32>
    %161 = math.rsqrt %160 : vector<16x1xf32>
    %162 = vector.broadcast %161 : vector<16x1xf32> to vector<16x128xf32>
    %163 = arith.mulf %153, %162 : vector<16x128xf32>
    %164 = vector.broadcast %143 : vector<1x128xf32> to vector<16x128xf32>
    %165 = arith.mulf %163, %164 : vector<16x128xf32>
    %166 = vector.broadcast %145 : vector<1x128xf32> to vector<16x128xf32>
    %167 = arith.addf %165, %166 : vector<16x128xf32>
    %168 = arith.truncf %167 : vector<16x128xf32> to vector<16x128xbf16>
    %c0_53 = arith.constant 0 : index
    %c0_54 = arith.constant 0 : index
    %c0_55 = arith.constant 0 : index
    %169 = vector.load %arg11[%c0_53, %c0_54, %c0_55] : memref<1x128x128xbf16, #tpu.memory_space<vmem>>, vector<1x128x128xbf16>
    %170 = vector.shape_cast %169 : vector<1x128x128xbf16> to vector<128x128xbf16>
    %cst_56 = arith.constant dense<0.000000e+00> : vector<16x128xf32>
    %171 = tpu.matmul %168, %170, %cst_56 {dimension_numbers = #tpu.dot_dimension_numbers<[1], [0], [0], [1], [0, 0, 1, 1], [], []>} : vector<16x128xbf16>, vector<128x128xbf16>, vector<16x128xf32> -> vector<16x128xf32>
    %c0_57 = arith.constant 0 : index
    %c0_58 = arith.constant 0 : index
    %c0_59 = arith.constant 0 : index
    %172 = vector.load %arg12[%c0_57, %c0_58, %c0_59] : memref<1x1x128xf32, #tpu.memory_space<vmem>>, vector<1x1x128xf32>
    %173 = vector.shape_cast %172 : vector<1x1x128xf32> to vector<1x128xf32>
    %174 = vector.broadcast %173 : vector<1x128xf32> to vector<16x128xf32>
    %175 = arith.addf %171, %174 : vector<16x128xf32>
    %cst_60 = arith.constant 5.000000e-01 : f32
    %176 = vector.broadcast %cst_60 : f32 to vector<16x128xf32>
    %177 = arith.mulf %176, %175 : vector<16x128xf32>
    %cst_61 = arith.constant 4.471500e-02 : f32
    %178 = vector.broadcast %cst_61 : f32 to vector<16x128xf32>
    %179 = arith.mulf %178, %175 : vector<16x128xf32>
    %180 = arith.mulf %179, %175 : vector<16x128xf32>
    %181 = arith.mulf %180, %175 : vector<16x128xf32>
    %182 = arith.addf %175, %181 : vector<16x128xf32>
    %cst_62 = arith.constant 0.797884583 : f32
    %183 = vector.broadcast %cst_62 : f32 to vector<16x128xf32>
    %184 = arith.mulf %183, %182 : vector<16x128xf32>
    %185 = math.tanh %184 : vector<16x128xf32>
    %cst_63 = arith.constant 1.000000e+00 : f32
    %186 = vector.broadcast %cst_63 : f32 to vector<16x128xf32>
    %187 = arith.addf %186, %185 : vector<16x128xf32>
    %188 = arith.mulf %177, %187 : vector<16x128xf32>
    %189 = arith.truncf %188 : vector<16x128xf32> to vector<16x128xbf16>
    %c0_64 = arith.constant 0 : index
    %c0_65 = arith.constant 0 : index
    %c0_66 = arith.constant 0 : index
    %190 = vector.load %arg13[%c0_64, %c0_65, %c0_66] : memref<1x128x128xbf16, #tpu.memory_space<vmem>>, vector<1x128x128xbf16>
    %191 = vector.shape_cast %190 : vector<1x128x128xbf16> to vector<128x128xbf16>
    %cst_67 = arith.constant dense<0.000000e+00> : vector<16x128xf32>
    %192 = tpu.matmul %189, %191, %cst_67 {dimension_numbers = #tpu.dot_dimension_numbers<[1], [0], [0], [1], [0, 0, 1, 1], [], []>} : vector<16x128xbf16>, vector<128x128xbf16>, vector<16x128xf32> -> vector<16x128xf32>
    %c0_68 = arith.constant 0 : index
    %c0_69 = arith.constant 0 : index
    %c0_70 = arith.constant 0 : index
    %193 = vector.load %arg14[%c0_68, %c0_69, %c0_70] : memref<1x1x128xf32, #tpu.memory_space<vmem>>, vector<1x1x128xf32>
    %194 = vector.shape_cast %193 : vector<1x1x128xf32> to vector<1x128xf32>
    %195 = vector.broadcast %194 : vector<1x128xf32> to vector<16x128xf32>
    %196 = arith.addf %192, %195 : vector<16x128xf32>
    %197 = arith.addf %167, %196 : vector<16x128xf32>
    %c0_71 = arith.constant 0 : index
    %c0_72 = arith.constant 0 : index
    %c0_73 = arith.constant 0 : index
    %198 = vector.load %arg15[%c0_71, %c0_72, %c0_73] : memref<1x1x128xf32, #tpu.memory_space<vmem>>, vector<1x1x128xf32>
    %199 = vector.shape_cast %198 : vector<1x1x128xf32> to vector<1x128xf32>
    %c0_74 = arith.constant 0 : index
    %c0_75 = arith.constant 0 : index
    %c0_76 = arith.constant 0 : index
    %200 = vector.load %arg16[%c0_74, %c0_75, %c0_76] : memref<1x1x128xf32, #tpu.memory_space<vmem>>, vector<1x1x128xf32>
    %201 = vector.shape_cast %200 : vector<1x1x128xf32> to vector<1x128xf32>
    %cst_77 = arith.constant dense<0.000000e+00> : vector<16xf32>
    %202 = vector.multi_reduction <add>, %197, %cst_77 [1] : vector<16x128xf32> to vector<16xf32>
    %203 = vector.shape_cast %202 : vector<16xf32> to vector<16x1xf32>
    %cst_78 = arith.constant 3.125000e-02 : f32
    %204 = vector.broadcast %cst_78 : f32 to vector<16x1xf32>
    %205 = arith.mulf %203, %204 : vector<16x1xf32>
    %206 = vector.broadcast %205 : vector<16x1xf32> to vector<16x128xf32>
    %207 = arith.subf %197, %206 : vector<16x128xf32>
    %208 = vector.broadcast %4 : vector<1x128xf32> to vector<16x128xf32>
    %209 = arith.mulf %207, %208 : vector<16x128xf32>
    %210 = arith.mulf %209, %209 : vector<16x128xf32>
    %cst_79 = arith.constant dense<0.000000e+00> : vector<16xf32>
    %211 = vector.multi_reduction <add>, %210, %cst_79 [1] : vector<16x128xf32> to vector<16xf32>
    %212 = vector.shape_cast %211 : vector<16xf32> to vector<16x1xf32>
    %cst_80 = arith.constant 3.125000e-02 : f32
    %213 = vector.broadcast %cst_80 : f32 to vector<16x1xf32>
    %214 = arith.mulf %212, %213 : vector<16x1xf32>
    %cst_81 = arith.constant 9.99999996E-13 : f32
    %215 = vector.broadcast %cst_81 : f32 to vector<16x1xf32>
    %216 = arith.addf %214, %215 : vector<16x1xf32>
    %217 = math.rsqrt %216 : vector<16x1xf32>
    %218 = vector.broadcast %217 : vector<16x1xf32> to vector<16x128xf32>
    %219 = arith.mulf %209, %218 : vector<16x128xf32>
    %220 = vector.broadcast %199 : vector<1x128xf32> to vector<16x128xf32>
    %221 = arith.mulf %219, %220 : vector<16x128xf32>
    %222 = vector.broadcast %201 : vector<1x128xf32> to vector<16x128xf32>
    %223 = arith.addf %221, %222 : vector<16x128xf32>
    %c0_82 = arith.constant 0 : index
    %c0_83 = arith.constant 0 : index
    %224 = vector.load %arg22[%c0_82, %c0_83] : memref<16x128xf32, #tpu.memory_space<vmem>>, vector<16x128xf32>
    tpu.vector_store %arg22[%c0_82, %c0_83], %223 {strides = array<i32>} : memref<16x128xf32, #tpu.memory_space<vmem>>, vector<16x128xf32>,
    %c1_i32 = arith.constant 1 : i32
    %225 = arith.cmpi eq, %arg0, %c1_i32 : i32
    %226 = arith.extui %225 : i1 to i32
    %c0_i32_84 = arith.constant 0 : i32
    %227 = arith.cmpi ne, %226, %c0_i32_84 : i32
    scf.if %227 {
      %228 = vector.extract_strided_slice %223 {offsets = [0, 0], sizes = [1, 128], strides = [1, 1]} : vector<16x128xf32> to vector<1x128xf32>
      %229 = vector.extract_strided_slice %223 {offsets = [8, 0], sizes = [1, 128], strides = [1, 1]} : vector<16x128xf32> to vector<1x128xf32>
      %230 = tpu.concatenate %228, %229 in 0 : vector<1x128xf32>, vector<1x128xf32> -> vector<2x128xf32>
      %231 = arith.truncf %230 : vector<2x128xf32> to vector<2x128xbf16>
      %c0_85 = arith.constant 0 : index
      %c0_86 = arith.constant 0 : index
      %232 = vector.load %arg17[%c0_85, %c0_86] : memref<128x128xbf16, #tpu.memory_space<vmem>>, vector<128x128xbf16>
      %cst_87 = arith.constant dense<0.000000e+00> : vector<2x128xf32>
      %233 = tpu.matmul %231, %232, %cst_87 {dimension_numbers = #tpu.dot_dimension_numbers<[1], [0], [0], [1], [0, 0, 1, 1], [], []>} : vector<2x128xbf16>, vector<128x128xbf16>, vector<2x128xf32> -> vector<2x128xf32>
      %c0_88 = arith.constant 0 : index
      %c0_89 = arith.constant 0 : index
      %234 = vector.load %arg18[%c0_88, %c0_89] : memref<1x128xf32, #tpu.memory_space<vmem>>, vector<1x128xf32>
      %235 = vector.broadcast %234 : vector<1x128xf32> to vector<2x128xf32>
      %236 = arith.addf %233, %235 : vector<2x128xf32>
      %237 = math.tanh %236 : vector<2x128xf32>
      %238 = arith.truncf %237 : vector<2x128xf32> to vector<2x128xbf16>
      %c0_90 = arith.constant 0 : index
      %c0_91 = arith.constant 0 : index
      %239 = vector.load %arg19[%c0_90, %c0_91] : memref<128x128xbf16, #tpu.memory_space<vmem>>, vector<128x128xbf16>
      %cst_92 = arith.constant dense<0.000000e+00> : vector<2x128xf32>
      %240 = tpu.matmul %238, %239, %cst_92 {dimension_numbers = #tpu.dot_dimension_numbers<[1], [0], [0], [1], [0, 0, 1, 1], [], []>} : vector<2x128xbf16>, vector<128x128xbf16>, vector<2x128xf32> -> vector<2x128xf32>
      %c0_93 = arith.constant 0 : index
      %c0_94 = arith.constant 0 : index
      %241 = vector.load %arg20[%c0_93, %c0_94] : memref<1x128xf32, #tpu.memory_space<vmem>>, vector<1x128xf32>
      %242 = vector.broadcast %241 : vector<1x128xf32> to vector<2x128xf32>
      %243 = arith.addf %240, %242 : vector<2x128xf32>
      %c0_95 = arith.constant 0 : index
      %c0_96 = arith.constant 0 : index
      %244 = vector.load %arg21[%c0_95, %c0_96] : memref<2x128xf32, #tpu.memory_space<vmem>>, vector<2x128xf32>
      tpu.vector_store %arg21[%c0_95, %c0_96], %243 {strides = array<i32>} : memref<2x128xf32, #tpu.memory_space<vmem>>, vector<2x128xf32>,
    } else {
    }
    return
  }
  func.func @transform_0(%arg0: i32) -> (i32, i32) {
    %c0_i32 = arith.constant 0 : i32
    %c0_i32_0 = arith.constant 0 : i32
    %c0_i32_1 = arith.constant 0 : i32
    return %c0_i32, %c0_i32_0 : i32, i32
  }
  func.func @transform_1(%arg0: i32) -> (i32, i32, i32) {
    %c0_i32 = arith.constant 0 : i32
    %c0_i32_0 = arith.constant 0 : i32
    %c0_i32_1 = arith.constant 0 : i32
    %c0_i32_2 = arith.constant 0 : i32
    return %c0_i32, %c0_i32_0, %c0_i32_1 : i32, i32, i32
  }
  func.func @transform_2(%arg0: i32) -> (i32, i32) {
    %c0_i32 = arith.constant 0 : i32
    %c0_i32_0 = arith.constant 0 : i32
    %c0_i32_1 = arith.constant 0 : i32
    return %c0_i32, %c0_i32_0 : i32, i32
  }
  func.func @transform_3(%arg0: i32) -> (i32, i32) {
    %c0_i32 = arith.constant 0 : i32
    %c0_i32_0 = arith.constant 0 : i32
    %c0_i32_1 = arith.constant 0 : i32
    return %c0_i32, %c0_i32_0 : i32, i32
  }
  func.func @transform_4(%arg0: i32) -> (i32, i32, i32) {
    %c0_i32 = arith.constant 0 : i32
    %c0_i32_0 = arith.constant 0 : i32
    %c0_i32_1 = arith.constant 0 : i32
    return %arg0, %c0_i32, %c0_i32_0 : i32, i32, i32
  }
  func.func @transform_5(%arg0: i32) -> (i32, i32, i32) {
    %c0_i32 = arith.constant 0 : i32
    %c0_i32_0 = arith.constant 0 : i32
    %c0_i32_1 = arith.constant 0 : i32
    return %arg0, %c0_i32, %c0_i32_0 : i32, i32, i32
  }
  func.func @transform_6(%arg0: i32) -> (i32, i32, i32) {
    %c0_i32 = arith.constant 0 : i32
    %c0_i32_0 = arith.constant 0 : i32
    %c0_i32_1 = arith.constant 0 : i32
    return %arg0, %c0_i32, %c0_i32_0 : i32, i32, i32
  }
  func.func @transform_7(%arg0: i32) -> (i32, i32, i32) {
    %c0_i32 = arith.constant 0 : i32
    %c0_i32_0 = arith.constant 0 : i32
    %c0_i32_1 = arith.constant 0 : i32
    return %arg0, %c0_i32, %c0_i32_0 : i32, i32, i32
  }
  func.func @transform_8(%arg0: i32) -> (i32, i32, i32) {
    %c0_i32 = arith.constant 0 : i32
    %c0_i32_0 = arith.constant 0 : i32
    %c0_i32_1 = arith.constant 0 : i32
    return %arg0, %c0_i32, %c0_i32_0 : i32, i32, i32
  }
  func.func @transform_9(%arg0: i32) -> (i32, i32, i32) {
    %c0_i32 = arith.constant 0 : i32
    %c0_i32_0 = arith.constant 0 : i32
    %c0_i32_1 = arith.constant 0 : i32
    return %arg0, %c0_i32, %c0_i32_0 : i32, i32, i32
  }
  func.func @transform_10(%arg0: i32) -> (i32, i32, i32) {
    %c0_i32 = arith.constant 0 : i32
    %c0_i32_0 = arith.constant 0 : i32
    %c0_i32_1 = arith.constant 0 : i32
    return %arg0, %c0_i32, %c0_i32_0 : i32, i32, i32
  }
  func.func @transform_11(%arg0: i32) -> (i32, i32, i32) {
    %c0_i32 = arith.constant 0 : i32
    %c0_i32_0 = arith.constant 0 : i32
    %c0_i32_1 = arith.constant 0 : i32
    return %arg0, %c0_i32, %c0_i32_0 : i32, i32, i32
  }
  func.func @transform_12(%arg0: i32) -> (i32, i32, i32) {
    %c0_i32 = arith.constant 0 : i32
    %c0_i32_0 = arith.constant 0 : i32
    %c0_i32_1 = arith.constant 0 : i32
    return %arg0, %c0_i32, %c0_i32_0 : i32, i32, i32
  }
  func.func @transform_13(%arg0: i32) -> (i32, i32, i32) {
    %c0_i32 = arith.constant 0 : i32
    %c0_i32_0 = arith.constant 0 : i32
    %c0_i32_1 = arith.constant 0 : i32
    return %arg0, %c0_i32, %c0_i32_0 : i32, i32, i32
  }
  func.func @transform_14(%arg0: i32) -> (i32, i32, i32) {
    %c0_i32 = arith.constant 0 : i32
    %c0_i32_0 = arith.constant 0 : i32
    %c0_i32_1 = arith.constant 0 : i32
    return %arg0, %c0_i32, %c0_i32_0 : i32, i32, i32
  }
  func.func @transform_15(%arg0: i32) -> (i32, i32, i32) {
    %c0_i32 = arith.constant 0 : i32
    %c0_i32_0 = arith.constant 0 : i32
    %c0_i32_1 = arith.constant 0 : i32
    return %arg0, %c0_i32, %c0_i32_0 : i32, i32, i32
  }
  func.func @transform_16(%arg0: i32) -> (i32, i32) {
    %c0_i32 = arith.constant 0 : i32
    %c0_i32_0 = arith.constant 0 : i32
    %c0_i32_1 = arith.constant 0 : i32
    return %c0_i32, %c0_i32_0 : i32, i32
  }
  func.func @transform_17(%arg0: i32) -> (i32, i32) {
    %c0_i32 = arith.constant 0 : i32
    %c0_i32_0 = arith.constant 0 : i32
    %c0_i32_1 = arith.constant 0 : i32
    return %c0_i32, %c0_i32_0 : i32, i32
  }
  func.func @transform_18(%arg0: i32) -> (i32, i32) {
    %c0_i32 = arith.constant 0 : i32
    %c0_i32_0 = arith.constant 0 : i32
    %c0_i32_1 = arith.constant 0 : i32
    return %c0_i32, %c0_i32_0 : i32, i32
  }
  func.func @transform_19(%arg0: i32) -> (i32, i32) {
    %c0_i32 = arith.constant 0 : i32
    %c0_i32_0 = arith.constant 0 : i32
    %c0_i32_1 = arith.constant 0 : i32
    return %c0_i32, %c0_i32_0 : i32, i32
  }
  func.func @transform_20(%arg0: i32) -> (i32, i32) {
    %c0_i32 = arith.constant 0 : i32
    %c0_i32_0 = arith.constant 0 : i32
    %c0_i32_1 = arith.constant 0 : i32
    return %c0_i32, %c0_i32_0 : i32, i32
  }
}

</mosaic_0001>

<bundles_post_ra>
// kernel: adaptive_lr_model_forward.1
= control target key start
LH: loop header
LB: loop body
LE: loop exit
PB: predicated region body
PF: predicated region fallthrough
CT: control target
= control target key end

     0   :  { %s5510_s0 = inlined_call_operand.vmem [shape: f32[16,128], index: 0, kind: input, shape index: {}]   ;;  %s5511_s1 = inlined_call_operand.vmem [shape: f32[2,8,8], index: 1, kind: input, shape index: {}]   ;;  %s5512_s2 = inlined_call_operand.hbm [shape: f32[1,128], index: 2, kind: input, shape index: {}]   ;;  %s5513_s3 = inlined_call_operand.hbm [shape: f32[1,128], index: 3, kind: input, shape index: {}]   ;;  %s5514_s4 = inlined_call_operand.vmem [shape: bf16[2,128,384], index: 4, kind: input, shape index: {}]   ;;  %s5515_s5 = inlined_call_operand.hbm [shape: f32[2,1,384], index: 5, kind: input, shape index: {}]   ;;  %s5516_s6 = inlined_call_operand.hbm [shape: bf16[2,32,128], index: 6, kind: input, shape index: {}]   ;;  %s5517_s7 = inlined_call_operand.vmem [shape: f32[2,1,128], index: 7, kind: input, shape index: {}]   ;;  %s5518_s8 = inlined_call_operand.vmem [shape: f32[2,1,128], index: 8, kind: input, shape index: {}]   ;;  %s5519_s9 = inlined_call_operand.hbm [shape: f32[2,1,128], index: 9, kind: input, shape index: {}]   ;;  %s5520_s10 = inlined_call_operand.hbm [shape: bf16[2,128,128], index: 10, kind: input, shape index: {}]   ;;  %s5521_s11 = inlined_call_operand.hbm [shape: f32[2,1,128], index: 11, kind: input, shape index: {}]   ;;  %s5522_s12 = inlined_call_operand.hbm [shape: bf16[2,128,128], index: 12, kind: input, shape index: {}]   ;;  %s5523_s13 = inlined_call_operand.hbm [shape: f32[2,1,128], index: 13, kind: input, shape index: {}]   ;;  %s5524_s14 = inlined_call_operand.hbm [shape: f32[2,1,128], index: 14, kind: input, shape index: {}]   ;;  %s5525_s15 = inlined_call_operand.hbm [shape: f32[2,1,128], index: 15, kind: input, shape index: {}]   ;;  %s5526_s16 = inlined_call_operand.hbm [shape: bf16[128,128], index: 16, kind: input, shape index: {}]   ;;  %s5527_s17 = inlined_call_operand.hbm [shape: f32[1,128], index: 17, kind: input, shape index: {}]   ;;  %s5528_s18 = inlined_call_operand.vmem [shape: bf16[128,128], index: 18, kind: input, shape index: {}]   ;;  %s5529_s19 = inlined_call_operand.hbm [shape: f32[1,128], index: 19, kind: input, shape index: {}]   ;;  %s5530_s20 = inlined_call_operand.hbm [shape: f32[2,128], index: 20, kind: output, shape index: {}]  }
   0x1   :  { %5569 = sst [smem:[#allocation34_spill]] %s5510_s0 }
   0x2   :  { %5570 = sst [smem:[#allocation35_spill]] %s5511_s1 }
   0x3   :  { %5571 = sst [smem:[#allocation36_spill]] %s5512_s2 }
   0x4   :  { %5572 = sst [smem:[#allocation37_spill]] %s5513_s3 }
   0x5   :  { %5573 = sst [smem:[#allocation38_spill]] %s5514_s4 }
   0x6   :  { %5574 = sst [smem:[#allocation39_spill]] %s5515_s5 }
   0x7   :  { %5575 = sst [smem:[#allocation40_spill]] %s5516_s6 }
   0x8   :  { %5576 = sst [smem:[#allocation41_spill]] %s5517_s7 }
   0x9   :  { %5577 = sst [smem:[#allocation42_spill]] %s5518_s8 }
   0xa   :  { %5578 = sst [smem:[#allocation43_spill]] %s5519_s9 }
   0xb   :  { %5579 = sst [smem:[#allocation44_spill]] %s5520_s10 }
   0xc   :  { %5580 = sst [smem:[#allocation45_spill]] %s5521_s11 }
   0xd   :  { %5581 = sst [smem:[#allocation46_spill]] %s5528_s18 }
   0xe   :  { %5582 = sst [smem:[#allocation47_spill]] %s5530_s20 }
   0xf   :  { %25 = vsyncpa [#allocation4], 0 }
  0x10   :  { %26 = vsyncpa [#allocation7], 0 }
  0x11   :  { %27 = vsyncpa [#allocation19], 0 }
  0x12   :  { %28 = vsyncpa [#allocation5], 0  ;;  %s4609_s1 = smov 0   ;;  %s4611_s22 = smov 0  }
  0x13   :  { %s4613_s23 = smov 0   ;;  %s4615_s24 = smov 0  }
  0x14 LB: > { %5583 = sst [smem:[#allocation28_spill]] %s4469_s22  ;;  %s4628_s2 = sadd.s32 4294967295, %s4477_s24   ;;  %s4477_s24 = sphi %s4615_s24, %s5648_s24   ;;  %s4473_s23 = sphi %s4613_s23, %s5651_s23   ;;  %s4469_s22 = sphi %s4611_s22, %s5650_s22   ;;  %s4465_s1 = sphi %s4609_s1, %s5649_s1  }
  0x15   : > { %5584 = sst [smem:[#allocation29_spill]] %s4473_s23  ;;  %s4631_s25 = sadd.s32 1, %s4477_s24  }
  0x16   : > { %5585 = sst [smem:[#allocation30_spill]] %s4628_s2  ;;  %s148_s3 = ssub.s32 %s4477_s24, %s4631_s25 }
  0x17   : > { %5586 = sst [smem:[#allocation31_spill]] %s4631_s25  ;;  %s151_s26 = sadd.s32 1, %s4473_s23 }
  0x18   : > { %p149_p0 = scmp.eq.s32.totalorder %s148_s3, 0  ;;  %p158_p1 = scmp.ne.s32.totalorder %s4473_s23, %s4469_s22 }
  0x19   : > { %p159_p2 = scmp.eq.s32.totalorder %s4477_s24, 0  ;;  %p164_p3 = scmp.ne.s32.totalorder %s4469_s22, %s4465_s1 }
  0x1a   : > { %s4641_s27 = scalar_select %p149_p0, %s4473_s23, %s151_s26  }
  0x1b   : > { %p4643_p4 = por %p159_p2, %p158_p1  ;;  %p5540_p5 = scmp.eq.s32.totalorder %s4628_s2, 0 }
  0x1c   : > { %5587 = sst [smem:[#allocation32_spill]] %s4641_s27  ;;  %p3288_p6 = scmp.ge.s32.totalorder %s4477_s24, 1 }
  0x1d   : > { %p540_p7 = scmp.lt.s32.totalorder %s4477_s24, 3  ;;  %p4652_p8 = por %p5540_p5, %p164_p3 }
  0x1e   : > { %s4479_s30 = smov [#allocation3]   ;;  %p3817_p12 = scmp.lt.s32.totalorder %s4477_s24, 2 }
  0x1f   : > { %s5589_s4 = scalar_select %p4652_p8, 1, 0 }
  0x20   : > { %p4657_p10 = pnand %p3288_p6, %p540_p7  ;;  %s559_s0 = sshll.u32 %s4479_s30, 4  ;;  %s560_s0 = int_to_ptr.vmem [resolvable:$true] %s559_s0 }
  0x21   : > { %5590 = sst [smem:[#allocation33_spill]] %s5589_s4  ;;  %p4673_p0 = pnand %p3817_p12, %p4643_p4 }
  0x22   : > { %s5591_s29 = scalar_select %p4657_p10, 1, 0 }
  0x23   : > { %p3768_p11 = pneg %p4657_p10  ;;  %s4678_s26 = sand.u32 1, %s4473_s23  }
  0x24   : > { %s5593_s3 = scalar_select %p4673_p0, 1, 0 }
  0x25   : > { %p4667_p13 = pnand %p3768_p11, %p5540_p5  ;;  %s3722_s30 = smul.u32 3, %s4678_s26 }
  0x26   : > { %s5594_s20 = sld [smem:[#allocation36_spill]] }
  0x27   : > { %s5592_s1 = scalar_select %p4667_p13, 1, 0 }
  0x28   : > { %p4689_p2 = pneg %p4667_p13 }
  0x2a   : > { %s5595_s28 = scalar_select %p4689_p2, 1, 0 }
  0x2c   : > { %s3987_s18 = scalar_lea.hbm %s5594_s20, 16 }
  0x2d   : > { %p3988_p1 = scmp.ne.s32.totalorder %s5594_s20, %s3987_s18  ;;  %p3994_p6 = scmp.lt.u32.totalorder %s3987_s18, %s5594_s20 }
  0x2f   : > { %p3990_p3 = pnand %p4689_p2, %p3988_p1 }
  0x31   : > { %p3991_p4 = pneg %p3990_p3 }
  0x33   : > { %p3996_p7 = pnand %p3994_p6, %p3991_p4 }
  0x35   : > { %3999 = shalt.err (!%p3996_p7)
}
  0x36   : > { %s4000_s25 = scalar_lea.vmem %s560_s0, 16  ;;  %s4007_s8 = scalar_lea.vmem %s560_s0, 32 }
  0x37   : > { %p4001_p11 = scmp.ne.s32.totalorder %s560_s0, %s4000_s25  ;;  %p4008_p5 = scmp.lt.s32.totalorder %s560_s0, %s560_s0 }
  0x38   : > { %p4009_p8 = scmp.lt.s32.totalorder %s4007_s8, %s4000_s25 }
  0x39   : > { %p4003_p12 = pnand %p4001_p11, %p4689_p2 }
  0x3a   : > { %p4010_p10 = por %p4009_p8, %p4008_p5 }
  0x3b   : > { %p4004_p9 = pneg %p4003_p12 }
  0x3d   : > { %p4011_p0 = pnand %p4010_p10, %p4004_p9 }
  0x3f   : > { %4014 = shalt.err (!%p4011_p0)
}
  0x40   : > { %3771 = dma.hbm_to_vmem [thread:$0]  (!%p4667_p13), %s5594_s20, 16, %s560_s0, [#allocation4]  }
  0x41   : > { %s3723_s7 = smul.u32 48, %s4477_s24  ;;  %s631_s18 = scalar_lea.vmem [#allocation8], %s3722_s30 }
  0x42   : > { %s639_s23 = sshll.u32 %s631_s18, 4  ;;  %s5596_s5 = sld [smem:[#allocation39_spill]]  ;;  %s4706_s23 = int_to_ptr.vmem [resolvable:$true] %s639_s23 }
  0x43   : > { %s5597_s8 = sand.u32 1, %s4477_s24   ;;  %p5598_p8 = scmp.ne.s32.totalorder %s5593_s3, 0 }
  0x44   : > { %s4715_s27 = scalar_lea.sflag [#allocation4], %s5597_s8 }
  0x45   : > { %p4721_p9 = pneg %p5598_p8 }
  0x47   : > { %s5599_s0 = scalar_select %p4721_p9, 1, 0 }
  0x48   : > { %s4711_s25 = scalar_lea.hbm %s5596_s5, %s3723_s7  ;;  %s4020_s30 = scalar_lea.hbm %s5596_s5, 96 }
  0x49   : > { %s4015_s21 = scalar_lea.hbm %s4711_s25, 48  ;;  %p4021_p1 = scmp.lt.u32.totalorder %s4711_s25, %s5596_s5 }
  0x4a   : > { %p4016_p5 = scmp.ne.s32.totalorder %s4711_s25, %s4015_s21  ;;  %p4022_p3 = scmp.lt.u32.totalorder %s4020_s30, %s4015_s21 }
  0x4b   : > { %p4024_p6 = scmp.lt.u32.totalorder %s4015_s21, %s4711_s25 }
  0x4c   : > { %p4018_p10 = pnand %p4721_p9, %p4016_p5  ;;  %p4023_p4 = por %p4022_p3, %p4021_p1 }
  0x4e   : > { %p4019_p0 = pneg %p4018_p10  ;;  %p4025_p7 = por %p4024_p6, %p4023_p4 }
  0x50   : > { %p4026_p11 = pnand %p4025_p7, %p4019_p0 }
  0x52   : > { %4029 = shalt.err (!%p4026_p11)
}
  0x53   : > { %s4030_s8 = scalar_lea.vmem %s4706_s23, 48  ;;  %s4480_s22 = smov [#allocation8]  }
  0x54   : > { %p4031_p12 = scmp.ne.s32.totalorder %s4706_s23, %s4030_s8  ;;  %s4035_s4 = sshll.u32 %s4480_s22, 4  ;;  %s4036_s4 = int_to_ptr.vmem [resolvable:$false] %s4035_s4 }
  0x55   : > { %s4037_s7 = scalar_lea.vmem %s4036_s4, 96  ;;  %p4038_p13 = scmp.lt.s32.totalorder %s4706_s23, %s4036_s4 }
  0x56   : > { %p4033_p5 = pnand %p4031_p12, %p4721_p9  ;;  %p4039_p2 = scmp.lt.s32.totalorder %s4037_s7, %s4030_s8 }
  0x58   : > { %p4034_p10 = pneg %p4033_p5  ;;  %p4040_p1 = por %p4039_p2, %p4038_p13 }
  0x5a   : > { %p4041_p3 = pnand %p4040_p1, %p4034_p10 }
  0x5c   : > { %4044 = shalt.err (!%p4041_p3)
}
  0x5d   : > { %3787 = dma.hbm_to_vmem [thread:$0]  (!%p5598_p8), %s4711_s25, 48, %s4706_s23, %s4715_s27  }
  0x5e   : > { %s3296_s21 = sshll.u32 %s4678_s26, 4  ;;  %s3414_s30 = sshll.u32 %s4477_s24, 8 }
  0x5f   : > { %s5600_s6 = sld [smem:[#allocation40_spill]]  ;;  %s650_s8 = scalar_lea.vmem [#allocation9], %s3296_s21 }
  0x60   : > { %s657_s7 = sshll.u32 %s650_s8, 4  ;;  %s4755_s5 = sshll.u32 %s4477_s24, 4  ;;  %s4752_s7 = int_to_ptr.vmem [resolvable:$true] %s657_s7 }
  0x65   : > { %s4750_s4 = scalar_lea.hbm %s5600_s6, %s3414_s30  ;;  %s4050_s30 = scalar_lea.hbm %s5600_s6, 512 }
  0x66   : > { %s4045_s20 = scalar_lea.hbm %s4750_s4, 256  ;;  %p4051_p4 = scmp.lt.u32.totalorder %s4750_s4, %s5600_s6 }
  0x67   : > { %p4046_p13 = scmp.ne.s32.totalorder %s4750_s4, %s4045_s20  ;;  %p4052_p6 = scmp.lt.u32.totalorder %s4050_s30, %s4045_s20 }
  0x68   : > { %p4054_p11 = scmp.lt.u32.totalorder %s4045_s20, %s4750_s4 }
  0x69   : > { %p4048_p2 = pnand %p4046_p13, %p4721_p9  ;;  %p4053_p7 = por %p4052_p6, %p4051_p4 }
  0x6b   : > { %p4049_p0 = pneg %p4048_p2  ;;  %p4055_p12 = por %p4054_p11, %p4053_p7 }
  0x6d   : > { %p4056_p5 = pnand %p4055_p12, %p4049_p0 }
  0x6f   : > { %4059 = shalt.err (!%p4056_p5)
}
  0x70   : > { %s4060_s21 = scalar_lea.vmem %s4752_s7, 256  ;;  %s4481_s8 = smov [#allocation9]  }
  0x71   : > { %p4061_p10 = scmp.ne.s32.totalorder %s4752_s7, %s4060_s21  ;;  %s4065_s23 = sshll.u32 %s4481_s8, 4  ;;  %s4066_s23 = int_to_ptr.vmem [resolvable:$false] %s4065_s23 }
  0x72   : > { %s4067_s25 = scalar_lea.vmem %s4066_s23, 512  ;;  %p4068_p13 = scmp.lt.s32.totalorder %s4752_s7, %s4066_s23 }
  0x73   : > { %p4063_p1 = pnand %p4061_p10, %p4721_p9  ;;  %p4069_p2 = scmp.lt.s32.totalorder %s4067_s25, %s4060_s21 }
  0x75   : > { %p4064_p3 = pneg %p4063_p1  ;;  %p4070_p4 = por %p4069_p2, %p4068_p13 }
  0x77   : > { %p4071_p6 = pnand %p4070_p4, %p4064_p3 }
  0x79   : > { %4074 = shalt.err (!%p4071_p6)
}
  0x7a   : > { %s5555_s20 = smov 64   ;;  %s5557_s30 = smov 4  }
  0x7b   : > { %3790 = dma.hbm_to_vmem [thread:$0]  (!%p5598_p8), %s4750_s4, 256, %s4752_s7, %s4715_s27, %s5555_s20, %s5555_s20, %s5557_s30  }
  0x7c   : > { %s5601_s9 = sld [smem:[#allocation43_spill]]  ;;  %s682_s8 = scalar_lea.vmem [#allocation10], %s4678_s26 }
  0x7d   : > { %s689_s23 = sshll.u32 %s682_s8, 4  ;;  %s5560_s25 = sshll.u32 %s4678_s26, 6  ;;  %s690_s23 = int_to_ptr.vmem [resolvable:$true] %s689_s23 }
  0x82   : > { %s4786_s21 = scalar_lea.hbm %s5601_s9, %s4755_s5  ;;  %s4080_s7 = scalar_lea.hbm %s5601_s9, 32 }
  0x83   : > { %s4075_s6 = scalar_lea.hbm %s4786_s21, 16  ;;  %p4081_p12 = scmp.lt.u32.totalorder %s4786_s21, %s5601_s9 }
  0x84   : > { %p4076_p0 = scmp.ne.s32.totalorder %s4786_s21, %s4075_s6  ;;  %p4082_p5 = scmp.lt.u32.totalorder %s4080_s7, %s4075_s6 }
  0x85   : > { %p4084_p1 = scmp.lt.u32.totalorder %s4075_s6, %s4786_s21 }
  0x86   : > { %p4078_p7 = pnand %p4076_p0, %p4721_p9  ;;  %p4083_p10 = por %p4082_p5, %p4081_p12 }
  0x88   : > { %p4079_p11 = pneg %p4078_p7  ;;  %p4085_p3 = por %p4084_p1, %p4083_p10 }
  0x8a   : > { %p4086_p13 = pnand %p4085_p3, %p4079_p11 }
  0x8c   : > { %4089 = shalt.err (!%p4086_p13)
}
  0x8d   : > { %s4090_s8 = scalar_lea.vmem %s690_s23, 16  ;;  %s4484_s20 = smov [#allocation10]  }
  0x8e   : > { %p4091_p2 = scmp.ne.s32.totalorder %s690_s23, %s4090_s8  ;;  %s4095_s30 = sshll.u32 %s4484_s20, 4  ;;  %s4096_s30 = int_to_ptr.vmem [resolvable:$false] %s4095_s30 }
  0x8f   : > { %s4097_s2 = scalar_lea.vmem %s4096_s30, 32  ;;  %p4098_p0 = scmp.lt.s32.totalorder %s690_s23, %s4096_s30 }
  0x90   : > { %p4093_p4 = pnand %p4091_p2, %p4721_p9  ;;  %p4099_p7 = scmp.lt.s32.totalorder %s4097_s2, %s4090_s8 }
  0x92   : > { %p4094_p6 = pneg %p4093_p4  ;;  %p4100_p8 = por %p4099_p7, %p4098_p0 }
  0x94   : > { %p4101_p5 = pnand %p4100_p8, %p4094_p6 }
  0x96   : > { %4104 = shalt.err (!%p4101_p5)
}
  0x97   : > { %p5602_p12 = scmp.ne.s32.totalorder %s5593_s3, 0  ;;  %s5561_s6 = sshll.u32 %s4477_s24, 10 }
  0x98   : > { %s5603_s10 = sld [smem:[#allocation44_spill]]  ;;  %s700_s30 = scalar_lea.vmem [#allocation11], %s5560_s25 }
  0x99   : > { %3793 = dma.hbm_to_vmem [thread:$0]  (!%p5602_p12), %s4786_s21, 16, %s690_s23, %s4715_s27  }
  0x9a   : > { %s707_s18 = sshll.u32 %s700_s30, 4  ;;  %s4818_s18 = int_to_ptr.vmem [resolvable:$true] %s707_s18 }
  0x9e   : > { %s4814_s7 = scalar_lea.hbm %s5603_s10, %s5561_s6  ;;  %s4110_s8 = scalar_lea.hbm %s5603_s10, 2048 }
  0x9f   : > { %s4105_s22 = scalar_lea.hbm %s4814_s7, 1024  ;;  %p4111_p1 = scmp.lt.u32.totalorder %s4814_s7, %s5603_s10 }
  0xa0   : > { %p4106_p8 = scmp.ne.s32.totalorder %s4814_s7, %s4105_s22  ;;  %p4112_p3 = scmp.lt.u32.totalorder %s4110_s8, %s4105_s22 }
  0xa1   : > { %p4114_p2 = scmp.lt.u32.totalorder %s4105_s22, %s4814_s7 }
  0xa2   : > { %p4108_p11 = pnand %p4106_p8, %p4721_p9  ;;  %p4113_p13 = por %p4112_p3, %p4111_p1 }
  0xa4   : > { %p4109_p10 = pneg %p4108_p11  ;;  %p4115_p4 = por %p4114_p2, %p4113_p13 }
  0xa6   : > { %p4116_p6 = pnand %p4115_p4, %p4109_p10 }
  0xa8   : > { %4119 = shalt.err (!%p4116_p6)
}
  0xa9   : > { %s4120_s20 = scalar_lea.vmem %s4818_s18, 1024  ;;  %s4485_s30 = smov [#allocation11]  }
  0xaa   : > { %p4121_p0 = scmp.ne.s32.totalorder %s4818_s18, %s4120_s20  ;;  %s4125_s21 = sshll.u32 %s4485_s30, 4  ;;  %s4126_s21 = int_to_ptr.vmem [resolvable:$false] %s4125_s21 }
  0xab   : > { %s4127_s23 = scalar_lea.vmem %s4126_s21, 2048  ;;  %p4128_p8 = scmp.lt.s32.totalorder %s4818_s18, %s4126_s21 }
  0xac   : > { %p4123_p7 = pnand %p4121_p0, %p4721_p9  ;;  %p4129_p11 = scmp.lt.s32.totalorder %s4127_s23, %s4120_s20 }
  0xae   : > { %p4124_p5 = pneg %p4123_p7  ;;  %p4130_p1 = por %p4129_p11, %p4128_p8 }
  0xb0   : > { %p4131_p3 = pnand %p4130_p1, %p4124_p5 }
  0xb2   : > { %4134 = shalt.err (!%p4131_p3)
}
  0xb3   : > { %s5604_s22 = smov 4   ;;  %s5605_s8 = smov 64  }
  0xb4   : > { %3796 = dma.hbm_to_vmem [thread:$0]  (!%p5602_p12), %s4814_s7, 1024, %s4818_s18, %s4715_s27, %s5605_s8, %s5605_s8, %s5604_s22  }
  0xb5   : > { %s5606_s11 = sld [smem:[#allocation45_spill]]  ;;  %s720_s20 = scalar_lea.vmem [#allocation12], %s4678_s26 }
  0xb6   : > { %s727_s21 = sshll.u32 %s720_s20, 4  ;;  %s728_s21 = int_to_ptr.vmem [resolvable:$true] %s727_s21 }
  0xbb   : > { %s4849_s30 = scalar_lea.hbm %s5606_s11, %s4755_s5  ;;  %s4140_s7 = scalar_lea.hbm %s5606_s11, 32 }
  0xbc   : > { %s4135_s23 = scalar_lea.hbm %s4849_s30, 16  ;;  %p4141_p4 = scmp.lt.u32.totalorder %s4849_s30, %s5606_s11 }
  0xbd   : > { %p4136_p10 = scmp.ne.s32.totalorder %s4849_s30, %s4135_s23  ;;  %p4142_p6 = scmp.lt.u32.totalorder %s4140_s7, %s4135_s23 }
  0xbe   : > { %p4144_p7 = scmp.lt.u32.totalorder %s4135_s23, %s4849_s30 }
  0xbf   : > { %p4138_p13 = pnand %p4136_p10, %p4721_p9  ;;  %p4143_p0 = por %p4142_p6, %p4141_p4 }
  0xc1   : > { %p4139_p2 = pneg %p4138_p13  ;;  %p4145_p5 = por %p4144_p7, %p4143_p0 }
  0xc3   : > { %p4146_p8 = pnand %p4145_p5, %p4139_p2 }
  0xc5   : > { %4149 = shalt.err (!%p4146_p8)
}
  0xc6   : > { %s4150_s4 = scalar_lea.vmem %s728_s21, 16  ;;  %s4486_s20 = smov [#allocation12]  }
  0xc7   : > { %p4151_p11 = scmp.ne.s32.totalorder %s728_s21, %s4150_s4  ;;  %s4155_s9 = sshll.u32 %s4486_s20, 4  ;;  %s4156_s9 = int_to_ptr.vmem [resolvable:$false] %s4155_s9 }
  0xc8   : > { %s4157_s25 = scalar_lea.vmem %s4156_s9, 32  ;;  %p4158_p10 = scmp.lt.s32.totalorder %s728_s21, %s4156_s9 }
  0xc9   : > { %p4153_p1 = pnand %p4151_p11, %p4721_p9  ;;  %p4159_p13 = scmp.lt.s32.totalorder %s4157_s25, %s4150_s4 }
  0xcb   : > { %p4154_p3 = pneg %p4153_p1  ;;  %p4160_p12 = por %p4159_p13, %p4158_p10 }
  0xcd   : > { %p4161_p4 = pnand %p4160_p12, %p4154_p3 }
  0xcf   : > { %4164 = shalt.err (!%p4161_p4)
}
  0xd0   : > { %p5607_p6 = scmp.ne.s32.totalorder %s5593_s3, 0  ;;  %s5608_s6 = sshll.u32 %s4477_s24, 10 }
  0xd1   : > { %s4875_s18 = scalar_lea.hbm %s5522_s12, %s5608_s6  ;;  %s5609_s2 = sshll.u32 %s4678_s26, 6 }
  0xd2   : > { %3799 = dma.hbm_to_vmem [thread:$0]  (!%p5607_p6), %s4849_s30, 16, %s728_s21, %s4715_s27  }
  0xd3   : > { %s738_s9 = scalar_lea.vmem [#allocation13], %s5609_s2  ;;  %s4165_s20 = scalar_lea.hbm %s4875_s18, 1024 }
  0xd4   : > { %s745_s4 = sshll.u32 %s738_s9, 4  ;;  %p4166_p12 = scmp.ne.s32.totalorder %s4875_s18, %s4165_s20  ;;  %s4879_s4 = int_to_ptr.vmem [resolvable:$true] %s745_s4 }
  0xd5   : > { %s4170_s21 = scalar_lea.hbm %s5522_s12, 2048  ;;  %p4171_p7 = scmp.lt.u32.totalorder %s4875_s18, %s5522_s12 }
  0xd6   : > { %p4168_p2 = pnand %p4166_p12, %p4721_p9  ;;  %p4172_p5 = scmp.lt.u32.totalorder %s4170_s21, %s4165_s20 }
  0xd7   : > { %p4174_p11 = scmp.lt.u32.totalorder %s4165_s20, %s4875_s18 }
  0xd8   : > { %p4169_p0 = pneg %p4168_p2  ;;  %p4173_p8 = por %p4172_p5, %p4171_p7 }
  0xda   : > { %p4175_p1 = por %p4174_p11, %p4173_p8 }
  0xdc   : > { %p4176_p3 = pnand %p4175_p1, %p4169_p0 }
  0xde   : > { %4179 = shalt.err (!%p4176_p3)
}
  0xdf   : > { %s4180_s23 = scalar_lea.vmem %s4879_s4, 1024  ;;  %s4487_s7 = smov [#allocation13]  }
  0xe0   : > { %p4181_p10 = scmp.ne.s32.totalorder %s4879_s4, %s4180_s23  ;;  %s4185_s2 = sshll.u32 %s4487_s7, 4  ;;  %s4186_s2 = int_to_ptr.vmem [resolvable:$false] %s4185_s2 }
  0xe1   : > { %s4187_s9 = scalar_lea.vmem %s4186_s2, 2048  ;;  %p4188_p12 = scmp.lt.s32.totalorder %s4879_s4, %s4186_s2 }
  0xe2   : > { %p4183_p13 = pnand %p4181_p10, %p4721_p9  ;;  %p4189_p2 = scmp.lt.s32.totalorder %s4187_s9, %s4180_s23 }
  0xe4   : > { %p4184_p4 = pneg %p4183_p13  ;;  %p4190_p7 = por %p4189_p2, %p4188_p12 }
  0xe6   : > { %p4191_p5 = pnand %p4190_p7, %p4184_p4 }
  0xe8   : > { %4194 = shalt.err (!%p4191_p5)
}
  0xe9   : > { %3802 = dma.hbm_to_vmem [thread:$0]  (!%p5607_p6), %s4875_s18, 1024, %s4879_s4, %s4715_s27, %s5605_s8, %s5605_s8, %s5604_s22  }
  0xea   : > { %s4910_s30 = scalar_lea.hbm %s5523_s13, %s4755_s5  ;;  %s758_s21 = scalar_lea.vmem [#allocation14], %s4678_s26 }
  0xeb   : > { %s765_s25 = sshll.u32 %s758_s21, 4  ;;  %s4195_s6 = scalar_lea.hbm %s4910_s30, 16  ;;  %s766_s25 = int_to_ptr.vmem [resolvable:$true] %s765_s25 }
  0xec   : > { %p4196_p0 = scmp.ne.s32.totalorder %s4910_s30, %s4195_s6  ;;  %s4200_s18 = scalar_lea.hbm %s5523_s13, 32 }
  0xed   : > { %p4201_p1 = scmp.lt.u32.totalorder %s4910_s30, %s5523_s13  ;;  %p4202_p3 = scmp.lt.u32.totalorder %s4200_s18, %s4195_s6 }
  0xee   : > { %p4198_p8 = pnand %p4196_p0, %p4721_p9  ;;  %p4204_p13 = scmp.lt.u32.totalorder %s4195_s6, %s4910_s30 }
  0xef   : > { %p4203_p10 = por %p4202_p3, %p4201_p1 }
  0xf0   : > { %p4199_p11 = pneg %p4198_p8 }
  0xf1   : > { %p4205_p4 = por %p4204_p13, %p4203_p10 }
  0xf3   : > { %p4206_p12 = pnand %p4205_p4, %p4199_p11 }
  0xf5   : > { %4209 = shalt.err (!%p4206_p12)
}
  0xf6   : > { %s4210_s9 = scalar_lea.vmem %s766_s25, 16  ;;  %s4488_s20 = smov [#allocation14]  }
  0xf7   : > { %p4211_p2 = scmp.ne.s32.totalorder %s766_s25, %s4210_s9  ;;  %s4215_s24 = sshll.u32 %s4488_s20, 4  ;;  %s4216_s24 = int_to_ptr.vmem [resolvable:$false] %s4215_s24 }
  0xf8   : > { %s4217_s21 = scalar_lea.vmem %s4216_s24, 32  ;;  %p4218_p0 = scmp.lt.s32.totalorder %s766_s25, %s4216_s24 }
  0xf9   : > { %p4213_p7 = pnand %p4211_p2, %p4721_p9  ;;  %p4219_p8 = scmp.lt.s32.totalorder %s4217_s21, %s4210_s9 }
  0xfb   : > { %p4214_p5 = pneg %p4213_p7  ;;  %p4220_p6 = por %p4219_p8, %p4218_p0 }
  0xfd   : > { %p4221_p1 = pnand %p4220_p6, %p4214_p5 }
  0xff   : > { %4224 = shalt.err (!%p4221_p1)
}
 0x100   : > { %p5610_p3 = scmp.ne.s32.totalorder %s5593_s3, 0  ;;  %s4489_s6 = smov [#allocation6]  }
 0x101   : > { %s570_s23 = sshll.u32 %s4489_s6, 4  ;;  %s4490_s7 = smov [#allocation18]   ;;  %s571_s23 = int_to_ptr.vmem [resolvable:$true] %s570_s23 }
 0x102   : > { %3805 = dma.hbm_to_vmem [thread:$0]  (!%p5610_p3), %s4910_s30, 16, %s766_s25, %s4715_s27  }
 0x103   : > { %s594_s18 = sshll.u32 %s4490_s7, 4  ;;  %s5611_s20 = sld [smem:[#allocation37_spill]]  ;;  %s595_s18 = int_to_ptr.vmem [resolvable:$true] %s594_s18 }
 0x104   : > { %p5612_p11 = scmp.ne.s32.totalorder %s5595_s28, 0 }
 0x109   : > { %s4225_s10 = scalar_lea.hbm %s5611_s20, 16 }
 0x10a   : > { %p4226_p6 = scmp.ne.s32.totalorder %s5611_s20, %s4225_s10  ;;  %p4232_p4 = scmp.lt.u32.totalorder %s4225_s10, %s5611_s20 }
 0x10c   : > { %p4228_p10 = pnand %p4226_p6, %p5612_p11 }
 0x10e   : > { %p4229_p13 = pneg %p4228_p10 }
 0x110   : > { %p4234_p12 = pnand %p4232_p4, %p4229_p13 }
 0x112   : > { %4237 = shalt.err (!%p4234_p12)
}
 0x113   : > { %s4238_s30 = scalar_lea.vmem %s571_s23, 16  ;;  %s4245_s25 = scalar_lea.vmem %s571_s23, 32 }
 0x114   : > { %p4239_p2 = scmp.ne.s32.totalorder %s571_s23, %s4238_s30  ;;  %p4246_p0 = scmp.lt.s32.totalorder %s571_s23, %s571_s23 }
 0x115   : > { %p4247_p8 = scmp.lt.s32.totalorder %s4245_s25, %s4238_s30 }
 0x116   : > { %p4241_p7 = pnand %p4239_p2, %p5612_p11 }
 0x117   : > { %p4248_p1 = por %p4247_p8, %p4246_p0 }
 0x118   : > { %p4242_p5 = pneg %p4241_p7 }
 0x11a   : > { %p4249_p3 = pnand %p4248_p1, %p4242_p5 }
 0x11c   : > { %4252 = shalt.err (!%p4249_p3)
}
 0x11d   : > { %p5613_p6 = scmp.ne.s32.totalorder %s5592_s1, 0  ;;  %s4253_s4 = scalar_lea.hbm %s5527_s17, 16 }
 0x11e   : > { %p4254_p10 = scmp.ne.s32.totalorder %s5527_s17, %s4253_s4  ;;  %p4260_p3 = scmp.lt.u32.totalorder %s4253_s4, %s5527_s17 }
 0x11f   : > { %3774 = dma.hbm_to_vmem [thread:$0]  (!%p5613_p6), %s5611_s20, 16, %s571_s23, [#allocation7]  }
 0x120   : > { %p4256_p13 = pnand %p4254_p10, %p5612_p11 }
 0x122   : > { %p4257_p4 = pneg %p4256_p13 }
 0x124   : > { %p4262_p12 = pnand %p4260_p3, %p4257_p4 }
 0x126   : > { %4265 = shalt.err (!%p4262_p12)
}
 0x127   : > { %s4266_s30 = scalar_lea.vmem %s595_s18, 16  ;;  %s4273_s23 = scalar_lea.vmem %s595_s18, 32 }
 0x128   : > { %p4267_p2 = scmp.ne.s32.totalorder %s595_s18, %s4266_s30  ;;  %p4274_p0 = scmp.lt.s32.totalorder %s595_s18, %s595_s18 }
 0x129   : > { %p4275_p8 = scmp.lt.s32.totalorder %s4273_s23, %s4266_s30 }
 0x12a   : > { %p4269_p7 = pnand %p4267_p2, %p5612_p11 }
 0x12b   : > { %p4276_p1 = por %p4275_p8, %p4274_p0 }
 0x12c   : > { %p4270_p5 = pneg %p4269_p7 }
 0x12e   : > { %p4277_p9 = pnand %p4276_p1, %p4270_p5 }
 0x130   : > { %4280 = shalt.err (!%p4277_p9)
}
 0x131   : > { %3780 = dma.hbm_to_vmem [thread:$0]  (!%p5613_p6), %s5527_s17, 16, %s595_s18, [#allocation19]  }
 0x132   : > { %s4971_s11 = scalar_lea.hbm %s5524_s14, %s4755_s5  ;;  %s775_s4 = scalar_lea.vmem [#allocation15], %s4678_s26 }
 0x133   : > { %s782_s2 = sshll.u32 %s775_s4, 4  ;;  %s4281_s24 = scalar_lea.hbm %s4971_s11, 16  ;;  %s783_s2 = int_to_ptr.vmem [resolvable:$true] %s782_s2 }
 0x134   : > { %p4282_p9 = scmp.ne.s32.totalorder %s4971_s11, %s4281_s24  ;;  %p5614_p10 = scmp.ne.s32.totalorder %s5599_s0, 0 }
 0x135   : > { %s4286_s18 = scalar_lea.hbm %s5524_s14, 32  ;;  %p4287_p3 = scmp.lt.u32.totalorder %s4971_s11, %s5524_s14 }
 0x136   : > { %p4284_p13 = pnand %p4282_p9, %p5614_p10  ;;  %p4288_p12 = scmp.lt.u32.totalorder %s4286_s18, %s4281_s24 }
 0x137   : > { %p4290_p7 = scmp.lt.u32.totalorder %s4281_s24, %s4971_s11 }
 0x138   : > { %p4285_p4 = pneg %p4284_p13  ;;  %p4289_p2 = por %p4288_p12, %p4287_p3 }
 0x13a   : > { %p4291_p5 = por %p4290_p7, %p4289_p2 }
 0x13c   : > { %p4292_p0 = pnand %p4291_p5, %p4285_p4 }
 0x13e   : > { %4295 = shalt.err (!%p4292_p0)
}
 0x13f   : > { %s4296_s25 = scalar_lea.vmem %s783_s2, 16  ;;  %s4491_s6 = smov [#allocation15]  }
 0x140   : > { %p4297_p8 = scmp.ne.s32.totalorder %s783_s2, %s4296_s25  ;;  %s4301_s7 = sshll.u32 %s4491_s6, 4  ;;  %s4302_s7 = int_to_ptr.vmem [resolvable:$false] %s4301_s7 }
 0x141   : > { %s4303_s10 = scalar_lea.vmem %s4302_s7, 32  ;;  %p4304_p13 = scmp.lt.s32.totalorder %s783_s2, %s4302_s7 }
 0x142   : > { %p4299_p1 = pnand %p4297_p8, %p5614_p10  ;;  %p4305_p6 = scmp.lt.s32.totalorder %s4303_s10, %s4296_s25 }
 0x144   : > { %p4300_p9 = pneg %p4299_p1  ;;  %p4306_p11 = por %p4305_p6, %p4304_p13 }
 0x146   : > { %p4307_p3 = pnand %p4306_p11, %p4300_p9 }
 0x148   : > { %4310 = shalt.err (!%p4307_p3)
}
 0x149   : > { %p5615_p12 = scmp.ne.s32.totalorder %s5593_s3, 0  ;;  %s4492_s4 = smov [#allocation17]  }
 0x14a   : > { %s580_s24 = sshll.u32 %s4492_s4, 4  ;;  %s4493_s9 = smov [#allocation20]   ;;  %s581_s24 = int_to_ptr.vmem [resolvable:$true] %s580_s24 }
 0x14b   : > { %3808 = dma.hbm_to_vmem [thread:$0]  (!%p5615_p12), %s4971_s11, 16, %s783_s2, %s4715_s27  }
 0x14c   : > { %s608_s21 = sshll.u32 %s4493_s9, 4  ;;  %s4311_s23 = scalar_lea.hbm %s5526_s16, 1024  ;;  %s609_s21 = int_to_ptr.vmem [resolvable:$true] %s608_s21 }
 0x14d   : > { %p4312_p11 = scmp.ne.s32.totalorder %s5526_s16, %s4311_s23  ;;  %p5616_p6 = scmp.ne.s32.totalorder %s5595_s28, 0 }
 0x14e   : > { %p4318_p7 = scmp.lt.u32.totalorder %s4311_s23, %s5526_s16 }
 0x14f   : > { %p4314_p4 = pnand %p4312_p11, %p5616_p6 }
 0x151   : > { %p4315_p2 = pneg %p4314_p4 }
 0x153   : > { %p4320_p5 = pnand %p4318_p7, %p4315_p2 }
 0x155   : > { %4323 = shalt.err (!%p4320_p5)
}
 0x156   : > { %s4324_s11 = scalar_lea.vmem %s581_s24, 1024  ;;  %p4332_p9 = scmp.lt.s32.totalorder %s581_s24, %s581_s24 }
 0x157   : > { %p4325_p0 = scmp.ne.s32.totalorder %s581_s24, %s4324_s11  ;;  %p4333_p13 = scmp.lt.s32.totalorder %s4324_s11, %s4324_s11 }
 0x159   : > { %p4327_p8 = pnand %p4325_p0, %p5616_p6  ;;  %p4334_p3 = por %p4333_p13, %p4332_p9 }
 0x15b   : > { %p4328_p1 = pneg %p4327_p8 }
 0x15d   : > { %p4335_p12 = pnand %p4334_p3, %p4328_p1 }
 0x15f   : > { %4338 = shalt.err (!%p4335_p12)
}
 0x160   : > { %p5617_p11 = scmp.ne.s32.totalorder %s5592_s1, 0  ;;  %s4339_s30 = scalar_lea.hbm %s5529_s19, 16 }
 0x161   : > { %p4340_p4 = scmp.ne.s32.totalorder %s5529_s19, %s4339_s30  ;;  %p4346_p7 = scmp.lt.u32.totalorder %s4339_s30, %s5529_s19 }
 0x162   : > { %3777 = dma.hbm_to_vmem [thread:$0]  (!%p5617_p11), %s5526_s16, 1024, %s581_s24, [#allocation7], %s5605_s8, %s5605_s8, %s5604_s22  }
 0x163   : > { %p4342_p12 = pnand %p4340_p4, %p5616_p6 }
 0x165   : > { %p4343_p2 = pneg %p4342_p12 }
 0x167   : > { %p4348_p5 = pnand %p4346_p7, %p4343_p2 }
 0x169   : > { %4351 = shalt.err (!%p4348_p5)
}
 0x16a   : > { %s4352_s10 = scalar_lea.vmem %s609_s21, 16  ;;  %s4359_s22 = scalar_lea.vmem %s609_s21, 32 }
 0x16b   : > { %p4353_p0 = scmp.ne.s32.totalorder %s609_s21, %s4352_s10  ;;  %p4360_p9 = scmp.lt.s32.totalorder %s609_s21, %s609_s21 }
 0x16c   : > { %p4361_p13 = scmp.lt.s32.totalorder %s4359_s22, %s4352_s10 }
 0x16d   : > { %p4355_p8 = pnand %p4353_p0, %p5616_p6 }
 0x16e   : > { %p4362_p3 = por %p4361_p13, %p4360_p9 }
 0x16f   : > { %p4356_p1 = pneg %p4355_p8 }
 0x171   : > { %p4363_p10 = pnand %p4362_p3, %p4356_p1 }
 0x173   : > { %4366 = shalt.err (!%p4363_p10)
}
 0x174   : > { %3783 = dma.hbm_to_vmem [thread:$0]  (!%p5617_p11), %s5529_s19, 16, %s609_s21, [#allocation19]  }
 0x175   : > { %s5035_s28 = scalar_lea.hbm %s5525_s15, %s4755_s5  ;;  %s792_s4 = scalar_lea.vmem [#allocation16], %s4678_s26 }
 0x176   : > { %s799_s9 = sshll.u32 %s792_s4, 4  ;;  %s4367_s1 = scalar_lea.hbm %s5035_s28, 16  ;;  %s800_s9 = int_to_ptr.vmem [resolvable:$true] %s799_s9 }
 0x177   : > { %p4368_p10 = scmp.ne.s32.totalorder %s5035_s28, %s4367_s1  ;;  %p5618_p6 = scmp.ne.s32.totalorder %s5599_s0, 0 }
 0x178   : > { %s4372_s21 = scalar_lea.hbm %s5525_s15, 32  ;;  %p4373_p11 = scmp.lt.u32.totalorder %s5035_s28, %s5525_s15 }
 0x179   : > { %p4370_p4 = pnand %p4368_p10, %p5618_p6  ;;  %p4374_p2 = scmp.lt.u32.totalorder %s4372_s21, %s4367_s1 }
 0x17a   : > { %p4376_p5 = scmp.lt.u32.totalorder %s4367_s1, %s5035_s28 }
 0x17b   : > { %p4371_p12 = pneg %p4370_p4  ;;  %p4375_p7 = por %p4374_p2, %p4373_p11 }
 0x17d   : > { %p4377_p0 = por %p4376_p5, %p4375_p7 }
 0x17f   : > { %p4378_p8 = pnand %p4377_p0, %p4371_p12 }
 0x181   : > { %4381 = shalt.err (!%p4378_p8)
}
 0x182   : > { %s4382_s5 = scalar_lea.vmem %s800_s9, 16  ;;  %s4494_s26 = smov [#allocation16]  }
 0x183   : > { %p4383_p1 = scmp.ne.s32.totalorder %s800_s9, %s4382_s5  ;;  %s4387_s25 = sshll.u32 %s4494_s26, 4  ;;  %s4388_s25 = int_to_ptr.vmem [resolvable:$false] %s4387_s25 }
 0x184   : > { %s4389_s7 = scalar_lea.vmem %s4388_s25, 32  ;;  %p4390_p3 = scmp.lt.s32.totalorder %s800_s9, %s4388_s25 }
 0x185   : > { %p4385_p9 = pnand %p4383_p1, %p5618_p6  ;;  %p4391_p10 = scmp.lt.s32.totalorder %s4389_s7, %s4382_s5 }
 0x187   : > { %p4386_p13 = pneg %p4385_p9  ;;  %p4392_p4 = por %p4391_p10, %p4390_p3 }
 0x189   : > { %p4393_p2 = pnand %p4392_p4, %p4386_p13 }
 0x18b   : > { %4396 = shalt.err (!%p4393_p2)
}
 0x18c   : > { %p5619_p11 = scmp.ne.s32.totalorder %s5593_s3, 0  ;;  %p5620_p12 = scmp.ne.s32.totalorder %s5591_s29, 0 }
 0x18d   : > { %s5621_s0 = sld [smem:[#allocation30_spill]] (!%p5620_p12) }
 0x18e   : > { %3811 = dma.hbm_to_vmem [thread:$0]  (!%p5619_p11), %s5035_s28, 16, %s800_s9, %s4715_s27  }
 0x18f   : > { %808 = sbr.rel (%p5620_p12) target bundleno = 5605 (0x15e5), region = 100 }
 0x193   : > { %p5622_p6 = scmp.eq.s32.totalorder (!%p5620_p12), %s5621_s0, 0 }
 0x196   : > { %4440 = dma.done.wait (%p5622_p6), [#allocation4], 16   ;;  %p5623_p7 = pmov %p5622_p6 }
 0x197   : > { %p5624_p5 = pmov %p5622_p6 }
 0x198   : > { %4442 = vsyncadd (%p5623_p7), [#allocation4], 4294967280 }
 0x199   : > { %4444 = dma.done.wait (%p5624_p5), [#allocation7], 16   ;;  %p5625_p0 = pmov %p5624_p5 }
 0x19a   : > { %s5626_s3 = sld [smem:[#allocation28_spill]]  ;;  %s5627_s10 = sld [smem:[#allocation33_spill]] }
 0x19b   : > { %4446 = vsyncadd (%p5625_p0), [#allocation7], 4294967280  ;;  %s818_s22 = sand.u32 1, %s5621_s0  }
 0x19c   : > { %s819_s8 = scalar_lea.sflag [#allocation4], %s818_s22 }
 0x1a0   : > { %s5068_s27 = sand.u32 1, %s5626_s3   ;;  %p5628_p8 = scmp.ne.s32.totalorder %s5627_s10, 0 }
 0x1a1   : > { %s3724_s29 = smul.u32 3, %s5068_s27 }
 0x1a3   : > { %s5071_s24 = scalar_lea.vmem [#allocation8], %s3724_s29 }
 0x1a4   : > { %4448 = dma.done.wait (%p5628_p8), %s819_s8, 2432  }
 0x1a5   : > { %4450 = vsyncadd (%p5628_p8), %s819_s8, 4294964864  ;;  %s3313_s11 = sshll.u32 %s5068_s27, 4  ;;  %s3314_s2 = sshll.u32 %s5068_s27, 6 }
 0x1a6   : > { %s5079_s28 = scalar_lea.vmem [#allocation9], %s3313_s11  ;;  %s839_s4 = scalar_lea.vmem [#allocation10], %s5068_s27 }
 0x1a7   : > { %s5082_s9 = scalar_lea.vmem [#allocation11], %s3314_s2  ;;  %s856_s1 = scalar_lea.vmem [#allocation12], %s5068_s27 }
 0x1a8   : > { %s5085_s18 = scalar_lea.vmem [#allocation13], %s3314_s2  ;;  %p5629_p1 = pmov %p5625_p0 }
 0x1a9   : > { %p5630_p9 = pmov %p5625_p0 }
 0x1aa   : > { %4452 = dma.done.wait (%p5629_p1), [#allocation7], 1024  }
 0x1ab   : > { %4454 = vsyncadd (%p5630_p9), [#allocation7], 4294966272  ;;  %p5631_p13 = pmov %p5625_p0 }
 0x1ac   : > { %p5632_p3 = pmov %p5625_p0 }
 0x1ad   : > { %4456 = dma.done.wait (%p5631_p13), [#allocation19], 32  }
 0x1ae   : > { %4458 = vsyncadd (%p5632_p3), [#allocation19], 4294967264  ;;  %p999_p10 = scmp.lt.s32.totalorder %s5621_s0, 1  ;;  %v1011_v0 = vlaneseq  ;;  %s5633_s7 = sld [smem:[#allocation41_spill]]  ;;  %v4495_v2 = vmov 0.0  }
 0x1af   : > { %s5634_s29 = sld [smem:[#allocation42_spill]]  ;;  %s5635_s23 = sld [smem:[#allocation38_spill]] }
 0x1b0   : > { %s5100_s6 = scalar_select %p999_p10, %s5621_s0, 1  ;;  %v1012_v1 = vand.u32 127, %v1011_v0 }
 0x1b1   : > { %p5636_p4 = scmp.ne.s32.totalorder %s5621_s0, 0 }
 0x1b2   : > { %s3725_s5 = smul.u32 192, %s5100_s6  ;;  %vm1013_vm0 = vcmp.lt.s32.totalorder %v1012_v1, 32  ;;  %s5637_s25 = sld [smem:[#allocation34_spill]] (!%p5636_p4)  ;;  %v3322_v23 = vld [vmem:[#allocation3] ss:$0 sm:$0xff] (!%p5636_p4) }
 0x1b3   : > { %v5113_v3 = vsel %vm1013_vm0, 1.0, %v4495_v2  ;;  %1019 = sbr.rel (%p5636_p4) target bundleno = 759 (0x2f7), region = 160  ;;  %v3323_v25 = vld [vmem:[#allocation6] ss:$0 sm:$0xff] (!%p5636_p4) }
 0x1b4   : > { %s1006_s3 = scalar_lea.vmem %s5633_s7, %s5100_s6 }
 0x1b5   : > { %s1009_s8 = scalar_lea.vmem %s5634_s29, %s5100_s6  ;;  %s5118_s21 = scalar_lea.vmem %s5635_s23, %s3725_s5 }
 0x1b8   : > { %v1020_v4 = vld [vmem:[%s5637_s25] sm:$0xff] (!%p5636_p4)  ;;  %v1021_v5 = vld [vmem:[%s5637_s25 + $0x8] sm:$0xff] (!%p5636_p4) }
 0x1b9   : > { %1024 = vadd.xlane.f32.xlu0 (!%p5636_p4), %v1020_v4 }
 0x1bd   : > { %1026 = vadd.xlane.f32.xlu0 %v1021_v5 }
 0x246   : > { %v1025_v6 = vpop.xlane.xlu0 %1024 }
 0x247   : > { %v1028_v7 = vmul.f32 0.03125, %v1025_v6 }
 0x249   : > { %v1030_v8 = vsub.f32 %v1020_v4, %v1028_v7 }
 0x24a   : > { %v1027_v9 = vpop.xlane.xlu0 %1026 }
 0x24b   : > { %v1029_v10 = vmul.f32 0.03125, %v1027_v9  ;;  %v1032_v11 = vmul.f32 %v5113_v3, %v1030_v8 }
 0x24d   : > { %v1031_v12 = vsub.f32 %v1021_v5, %v1029_v10  ;;  %v1034_v13 = vmul.f32 %v1032_v11, %v1032_v11 }
 0x24f   : > { %v1033_v14 = vmul.f32 %v5113_v3, %v1031_v12  ;;  %1036 = vadd.xlane.f32.xlu1 %v1034_v13 }
 0x251   : > { %v1035_v15 = vmul.f32 %v1033_v14, %v1033_v14 }
 0x253   : > { %1038 = vadd.xlane.f32.xlu1 %v1035_v15 }
 0x2dc   : > { %v1037_v16 = vpop.xlane.xlu1 %1036 }
 0x2dd   : > { %v1040_v17 = vmul.f32 0.03125, %v1037_v16 }
 0x2df   : > { %v1042_v18 = vadd.f32 1e-12, %v1040_v17 }
 0x2e0   : > { %v1039_v19 = vpop.xlane.xlu1 %1038 }
 0x2e1   : > { %3873 = vrsqrt.f32 %v1042_v18  ;;  %v1041_v20 = vmul.f32 0.03125, %v1039_v19 }
 0x2e3   : > { %v1043_v21 = vadd.f32 1e-12, %v1041_v20 }
 0x2e5   : > { %3875 = vrsqrt.f32 %v1043_v21 }
 0x2eb   : > { %v3874_v22 = vpop.eup %3873 }
 0x2ec   : > { %v1046_v24 = vmul.f32 %v3874_v22, %v1032_v11 }
 0x2ee   : > { %v1054_v26 = vmul.f32 %v3322_v23, %v1046_v24 }
 0x2ef   : > { %v3876_v27 = vpop.eup %3875 }
 0x2f0   : > { %v1062_v28 = vadd.f32 %v3323_v25, %v1054_v26  ;;  %v1047_v29 = vmul.f32 %v3876_v27, %v1033_v14 }
 0x2f2   : > { %1064 = vst [vmem:[#allocation2] sm:$0xff] %v1062_v28  ;;  %v1055_v30 = vmul.f32 %v3322_v23, %v1047_v29 }
 0x2f4   : > { %v1063_v31 = vadd.f32 %v3323_v25, %v1055_v30 }
 0x2f6   : > { %1065 = vst [vmem:[#allocation2 + $0x8] sm:$0xff] %v1063_v31 }
 0x2f7 PF: > { %v3877_v32 = vld [vmem:[%s5118_s21 + $0x4] ss:$12 sps:$4 sm:$0xff]   ;;  %3502 = vmatprep.subr.bf16.mxu1 %v4495_v2  ;;  %v3879_v33 = vld [vmem:[%s5118_s21] ss:$12 sps:$4 sm:$0xff]   ;;  %v4496_v34 = vmov 0   ;;  %vm4497_vm1 = vmmov 0  }
 0x2f8   : > { %1278 = vmatprep.mubr.bf16.mxu0 %v4496_v34  ;;  %1246 = vmatprep.subr.bf16.mxu0 %v3877_v32  ;;  %v3880_v35 = vld [vmem:[%s5118_s21 + $0x1c] ss:$12 sps:$4 sm:$0xff]   ;;  %v3882_v36 = vld [vmem:[%s5118_s21 + $0x18] ss:$12 sps:$4 sm:$0xff]   ;;  %v3883_v37 = vld [vmem:[%s5118_s21 + $0x34] ss:$12 sps:$4 sm:$0xff]  }
 0x2f9   : > { %1247 = vmatpush1.bf16.msra.mxu0 %v3879_v33  ;;  %v3885_v38 = vld [vmem:[%s5118_s21 + $0x30] ss:$12 sps:$4 sm:$0xff]   ;;  %v3886_v39 = vld [vmem:[%s5118_s21 + $0x4c] ss:$12 sps:$4 sm:$0xff]   ;;  %v3888_v40 = vld [vmem:[%s5118_s21 + $0x48] ss:$12 sps:$4 sm:$0xff]   ;;  %3518 = vmatprep.mubr.msk.bf16.mxu1 %vm4497_vm1, %v4495_v2 }
 0x2fa   : > { %1248 = vmatprep.subr.bf16.mxu0 %v3880_v35  ;;  %v3889_v41 = vld [vmem:[%s5118_s21 + $0x64] ss:$12 sps:$4 sm:$0xff]   ;;  %v3901_v42 = vld [vmem:[%s5118_s21 + $0x8] ss:$12 sps:$4 sm:$0xff]   ;;  %v3902_v43 = vld [vmem:[%s5118_s21 + $0x20] ss:$12 sps:$4 sm:$0xff]  }
 0x2fb   : > { %3503 = vmatpush3.bf16.msra.mxu1 %v3901_v42  ;;  %v3891_v44 = vld [vmem:[%s5118_s21 + $0x60] ss:$12 sps:$4 sm:$0xff]   ;;  %v3892_v45 = vld [vmem:[%s5118_s21 + $0x7c] ss:$12 sps:$4 sm:$0xff]   ;;  %v3894_v46 = vld [vmem:[%s5118_s21 + $0x78] ss:$12 sps:$4 sm:$0xff]  }
 0x2fc   : > { %3504 = vmatprep.subr.bf16.mxu1 %v4495_v2  ;;  %v3895_v47 = vld [vmem:[%s5118_s21 + $0x94] ss:$12 sps:$4 sm:$0xff]   ;;  %v3903_v48 = vld [vmem:[%s5118_s21 + $0x38] ss:$12 sps:$4 sm:$0xff]   ;;  %v3904_v49 = vld [vmem:[%s5118_s21 + $0x50] ss:$12 sps:$4 sm:$0xff]  }
 0x2fd   : > { %1249 = vmatpush1.bf16.msra.mxu0 %v3882_v36  ;;  %v3897_v50 = vld [vmem:[%s5118_s21 + $0x90] ss:$12 sps:$4 sm:$0xff]   ;;  %v3898_v51 = vld [vmem:[%s5118_s21 + $0xac] ss:$12 sps:$4 sm:$0xff]   ;;  %v3905_v52 = vld [vmem:[%s5118_s21 + $0x68] ss:$12 sps:$4 sm:$0xff]  }
 0x2fe   : > { %1250 = vmatprep.subr.bf16.mxu0 %v3883_v37  ;;  %v3900_v53 = vld [vmem:[%s5118_s21 + $0xa8] ss:$12 sps:$4 sm:$0xff]   ;;  %v5155_v54 = vld [vmem:[#allocation2] sm:$0xff]  ;;  %v3908_v59 = vld [vmem:[%s5118_s21 + $0xb0] ss:$12 sps:$4 sm:$0xff]   ;;  %v1104_v60 = vshrl.u32 %v1011_v0, 7 }
 0x2ff   : > { %3505 = vmatpush3.bf16.msra.mxu1 %v3902_v43  ;;  %v5157_v55 = vld [vmem:[#allocation2 + $0x8] sm:$0xff]  ;;  %v3907_v58 = vld [vmem:[%s5118_s21 + $0x98] ss:$12 sps:$4 sm:$0xff]   ;;  %vm1342_vm2 = vcmask 64512   ;;  %s4498_s0 = smov 120   ;;  %vm1466_vm3 = vcmask 1043456  }
 0x300   : > { %3506 = vmatprep.subr.bf16.mxu1 %v4495_v2  ;;  %v1068_v56 = vpack.c.bf16 %v5157_v55, %v5155_v54  ;;  %v3906_v57 = vld [vmem:[%s5118_s21 + $0x80] ss:$12 sps:$4 sm:$0xff]   ;;  %v1109_v61 = vsub.s32 1, %v1104_v60  ;;  %v1101_v62 = vld [vmem:[%s5071_s24] sm:$0x7]  ;;  %v1105_v1 = vsub.s32 0, %v1104_v60 }
 0x301   : > { %1251 = vmatpush1.bf16.msra.mxu0 %v3885_v38  ;;  %v1113_v18 = vsub.s32 2, %v1104_v60  ;;  %s5638_s21 = sld [smem:[#allocation35_spill]]  ;;  %s4499_s22 = smov 112  }
 0x302   : > { %1252 = vmatprep.subr.bf16.mxu0 %v3886_v39  ;;  %v1110_v63 = vrot.slane %v1101_v62, %v1109_v61  ;;  %v1106_v9 = vrot.slane %v1101_v62, %v1105_v1  ;;  %s4500_s29 = smov 104  }
 0x303   : > { %3507 = vmatpush3.bf16.msra.mxu1 %v3903_v48  ;;  %v1114_v19 = vrot.slane %v1101_v62, %v1113_v18 }
 0x304   : > { %3508 = vmatprep.subr.bf16.mxu1 %v4495_v2 }
 0x305   : > { %1253 = vmatpush1.bf16.msra.mxu0 %v3888_v40 }
 0x306   : > { %1254 = vmatprep.subr.bf16.mxu0 %v3889_v41 }
 0x307   : > { %3509 = vmatpush3.bf16.msra.mxu1 %v3904_v49  ;;  %v5215_v31 = vld [vmem:[%s5638_s21] sm:$0xff]  ;;  %v5220_v36 = vld [vmem:[%s5638_s21 + $0x8] sm:$0xff] }
 0x308   : > { %3510 = vmatprep.subr.bf16.mxu1 %v4495_v2 }
 0x309   : > { %1255 = vmatpush1.bf16.msra.mxu0 %v3891_v44 }
 0x30a   : > { %1256 = vmatprep.subr.bf16.mxu0 %v3892_v45 }
 0x30b   : > { %3511 = vmatpush3.bf16.msra.mxu1 %v3905_v52 }
 0x30c   : > { %3512 = vmatprep.subr.bf16.mxu1 %v4495_v2 }
 0x30d   : > { %1257 = vmatpush1.bf16.msra.mxu0 %v3894_v46 }
 0x30e   : > { %1258 = vmatprep.subr.bf16.mxu0 %v3895_v47 }
 0x30f   : > { %3513 = vmatpush3.bf16.msra.mxu1 %v3906_v57 }
 0x310   : > { %3514 = vmatprep.subr.bf16.mxu1 %v4495_v2 }
 0x311   : > { %1259 = vmatpush1.bf16.msra.mxu0 %v3897_v50 }
 0x312   : > { %1260 = vmatprep.subr.bf16.mxu0 %v3898_v51 }
 0x313   : > { %3515 = vmatpush3.bf16.msra.mxu1 %v3907_v58 }
 0x314   : > { %3516 = vmatprep.subr.bf16.mxu1 %v4495_v2 }
 0x315   : > { %1261 = vmatpush1.bf16.msra.mxu0 %v3900_v53 }
 0x316   : > { %3522 = vmatprep.subr.bf16.mxu0 %v4495_v2 }
 0x317   : > { %3517 = vmatpush3.bf16.msra.mxu1 %v3908_v59 }
 0x318   : > { %1279 = vmatmul.mubr.bf16.vlgmr.msra.gmra.mrb[0].mxu0 %v1068_v56  ;;  %3528 = vmatprep.subr.bf16.mxu1 %v4495_v2 }
 0x319   : > { %3524 = vmatprep.mubr.msk.bf16.mxu0 %vm4497_vm1, %v4495_v2 }
 0x31a   : > { %3519 = vmatmul.mubr.bf16.vlgmr.msra.gmra.mrb[0].mxu1 %v1068_v56 }
 0x31b   : > { %3530 = vmatprep.mubr.msk.bf16.mxu1 %vm4497_vm1, %v4495_v2 }
 0x3eb   : > { %v1280_v4 = vpop.f32.mrb[0].mxu0 }
 0x3ec   : > { %v1282_v5 = vpop.f32.mrb[1].mxu0  ;;  %v1281_v0 = vadd.f32 %v1280_v4, %v1106_v9 }
 0x3ed   : > { %v1283_v6 = vadd.f32 %v1282_v5, %v1110_v63  ;;  %v1284_v7 = vpop.f32.mrb[2].mxu0  ;;  %v1323_v20 = vpop.f32.mrb[0].mxu1 }
 0x3ee   : > { %v1286_v8 = vpop.f32.mrb[3].mxu0  ;;  %v1285_v15 = vadd.f32 %v1284_v7, %v1106_v9  ;;  %v5190_v16 = vpack.c.bf16 %v1281_v0, %v1281_v0  ;;  %v1324_v21 = vadd.f32 %v1323_v20, %v1114_v19  ;;  %v3520_v22 = vpop.f32.mrb[1].mxu1 }
 0x3ef   : > { %v5178_v10 = vpack.c.bf16 %v1283_v6, %v1283_v6  ;;  %v1287_v11 = vadd.f32 %v1286_v8, %v1110_v63  ;;  %v1326_v23 = vpop.f32.mrb[2].mxu1 }
 0x3f0   : > { %v5192_v17 = vpack.c.bf16 %v1285_v15, %v1285_v15  ;;  %v1327_v24 = vadd.f32 %v1326_v23, %v1114_v19  ;;  %v3521_v25 = vpop.f32.mrb[3].mxu1  ;;  %v5202_v26 = vpack.c.bf16 %v1324_v21, %v1324_v21 }
 0x3f1   : > { %v5180_v12 = vpack.c.bf16 %v1287_v11, %v1287_v11  ;;  %v1347_v13 = vsel %vm1342_vm2, %v5178_v10, 0 }
 0x3f2   : > { %3523 = vmatpush3.bf16.xpose.msra.mxu0 %v1347_v13  ;;  %v5204_v27 = vpack.c.bf16 %v1327_v24, %v1327_v24  ;;  %v1468_v28 = vsel %vm1466_vm3, %v5202_v26, 0 }
 0x3f3   : > { %1613 = vrot.lane.b32.xlu1 %v5180_v12, %s4498_s0  ;;  %v1393_v14 = vsel %vm1342_vm2, %v5180_v12, 0  ;;  %3534 = vmatprep.subr.bf16.mxu0 %v4495_v2 }
 0x3f4   : > { %3529 = vmatpush3.bf16.xpose.msra.mxu1 %v1393_v14  ;;  %v1514_v29 = vsel %vm1466_vm3, %v5204_v27, 0 }
 0x3f5   : > { %3540 = vmatprep.subr.bf16.mxu1 %v4495_v2 }
 0x3f9   : > { %3525 = vmatmul.mubr.msk.bf16.vlgmr.msra.gmra.mrb[4].mxu0 %vm1342_vm2, %v5190_v16 }
 0x3fa   : > { %3536 = vmatprep.mubr.msk.bf16.mxu0 %vm4497_vm1, %v4495_v2  ;;  %3535 = vmatpush3.bf16.msra.mxu0 %v1468_v28 }
 0x3fb   : > { %3531 = vmatmul.mubr.msk.bf16.vlgmr.msra.gmra.mrb[4].mxu1 %vm1342_vm2, %v5192_v17  ;;  %3546 = vmatprep.subr.bf16.mxu0 %v4495_v2 }
 0x3fc   : > { %3542 = vmatprep.mubr.msk.bf16.mxu1 %vm4497_vm1, %v4495_v2  ;;  %3541 = vmatpush3.bf16.msra.mxu1 %v1514_v29 }
 0x3fd   : > { %3552 = vmatprep.subr.bf16.mxu1 %v4495_v2 }
 0x465   : > { %v1614_v58 = vpop.permute.xlu1 %1613 }
 0x466   : > { %v1619_v8 = vsel %vm1342_vm2, %v1614_v58, 0 }
 0x4cc   : > { %v1383_v30 = vpop.f32.mrb[4].mxu0 }
 0x4cd   : > { %v1435_v32 = vmul.f32 0.35355338, %v1383_v30  ;;  %v3526_v33 = vpop.f32.mrb[5].mxu0 }
 0x4ce   : > { %v1386_v34 = vpop.f32.mrb[6].mxu0  ;;  %v1429_v35 = vpop.f32.mrb[4].mxu1 }
 0x4cf   : > { %v1436_v37 = vmul.f32 0.35355338, %v1429_v35  ;;  %v3527_v38 = vpop.f32.mrb[7].mxu0  ;;  %v3532_v39 = vpop.f32.mrb[5].mxu1  ;;  %v1437_v40 = vadd.f32 %v1435_v32, %v5215_v31 }
 0x4d0   : > { %v1432_v41 = vpop.f32.mrb[6].mxu1 }
 0x4d1   : > { %v3533_v42 = vpop.f32.mrb[7].mxu1  ;;  %v1439_v43 = vsel %vm1342_vm2, %v1437_v40, -inf  ;;  %v1438_v44 = vadd.f32 %v1436_v37, %v5220_v36 }
 0x4d2   : > { %1440 = vmax.xlane.f32.xlu0 %v1439_v43 }
 0x4d3   : > { %v1442_v45 = vsel %vm1342_vm2, %v1438_v44, -inf }
 0x4d6   : > { %1443 = vmax.xlane.f32.xlu0 %v1442_v45 }
 0x4ec   : > { %1561 = vrot.lane.b32.xlu0 %v5178_v10, %s4498_s0 }
 0x55f   : > { %v1441_v46 = vpop.xlane.xlu0 %1440 }
 0x560   : > { %v1445_v47 = vsub.f32 %v1437_v40, %v1441_v46 }
 0x562   : > { %v1447_v48 = vmul.f32 1.442695, %v1445_v47 }
 0x563   : > { %v1444_v49 = vpop.xlane.xlu0 %1443 }
 0x564   : > { %3925 = vpow2.f32 %v1447_v48  ;;  %v1446_v50 = vsub.f32 %v1438_v44, %v1444_v49 }
 0x566   : > { %v1449_v51 = vmul.f32 1.442695, %v1446_v50 }
 0x567   : > { %v1562_v63 = vpop.permute.xlu0 %1561 }
 0x568   : > { %3927 = vpow2.f32 %v1449_v51  ;;  %v1567_v5 = vsel %vm1342_vm2, %v1562_v63, 0 }
 0x56e   : > { %v3926_v52 = vpop.eup %3925 }
 0x56f   : > { %v1451_v53 = vsel %vm1342_vm2, %v3926_v52, 0.0 }
 0x570   : > { %1452 = vadd.xlane.f32.xlu1 %v1451_v53 }
 0x572   : > { %v3928_v56 = vpop.eup %3927 }
 0x573   : > { %v1454_v57 = vsel %vm1342_vm2, %v3928_v56, 0.0 }
 0x574   : > { %1455 = vadd.xlane.f32.xlu1 %v1454_v57 }
 0x585   : > { %1558 = vrot.lane.b32.xlu1 %v5190_v16, %s4498_s0 }
 0x589   : > { %1610 = vrot.lane.b32.xlu1 %v5192_v17, %s4498_s0 }
 0x5fd   : > { %v1453_v59 = vpop.xlane.xlu1 %1452 }
 0x5fe   : > { %3929 = vrcp.f32 %v1453_v59 }
 0x601   : > { %v1456_v60 = vpop.xlane.xlu1 %1455 }
 0x602   : > { %3931 = vrcp.f32 %v1456_v60  ;;  %v1333_v60 = vld [vmem:[%s5079_s28 + $0x4] sm:$0xf] }
 0x603   : > { %v1792_v63 = vsel %vm1466_vm3, %v1333_v60, 0 }
 0x605   : > { %v1559_v9 = vpop.permute.xlu1 %1558 }
 0x608   : > { %v3930_v61 = vpop.eup %3929 }
 0x609   : > { %v1458_v62 = vmul.f32 %v3930_v61, %v3926_v52  ;;  %v1611_v11 = vpop.permute.xlu1 %1610 }
 0x60b   : > { %v1461_v1 = vpack.c.bf16 %v1458_v62, %v1458_v62 }
 0x60c   : > { %v3932_v4 = vpop.eup %3931 }
 0x60d   : > { %v1460_v6 = vmul.f32 %v3932_v4, %v3928_v56  ;;  %3537 = vmatmul.mubr.msk.bf16.vlgmr.msra.gmra.mrb[8].mxu0 %vm1342_vm2, %v1461_v1  ;;  %v1332_v4 = vld [vmem:[%s5079_s28] sm:$0xf] }
 0x60e   : > { %3547 = vmatpush3.bf16.xpose.msra.mxu0 %v1567_v5  ;;  %3548 = vmatprep.mubr.msk.bf16.mxu0 %vm4497_vm1, %v4495_v2 }
 0x60f   : > { %v1462_v7 = vpack.c.bf16 %v1460_v6, %v1460_v6  ;;  %3558 = vmatprep.subr.bf16.mxu0 %v4495_v2 }
 0x611   : > { %3543 = vmatmul.mubr.msk.bf16.vlgmr.msra.gmra.mrb[8].mxu1 %vm1342_vm2, %v1462_v7  ;;  %v1839_v7 = vsel %vm1466_vm3, %v1332_v4, 0 }
 0x612   : > { %3553 = vmatpush3.bf16.xpose.msra.mxu1 %v1619_v8  ;;  %3554 = vmatprep.mubr.msk.bf16.mxu1 %vm4497_vm1, %v4495_v2 }
 0x613   : > { %3564 = vmatprep.subr.bf16.mxu1 %v4495_v2 }
 0x615   : > { %3549 = vmatmul.mubr.msk.bf16.vlgmr.msra.gmra.mrb[12].mxu0 %vm1342_vm2, %v1559_v9 }
 0x616   : > { %3560 = vmatprep.mubr.msk.bf16.mxu0 %vm4497_vm1, %v4495_v2 }
 0x619   : > { %3555 = vmatmul.mubr.msk.bf16.vlgmr.msra.gmra.mrb[12].mxu1 %vm1342_vm2, %v1611_v11 }
 0x61a   : > { %3566 = vmatprep.mubr.msk.bf16.mxu1 %vm4497_vm1, %v4495_v2 }
 0x6e0   : > { %v5250_v13 = vpop.f32.mrb[8].mxu0 }
 0x6e1   : > { %v3538_v0 = vpop.f32.mrb[9].mxu0 }
 0x6e2   : > { %v1507_v14 = vpop.f32.mrb[10].mxu0 }
 0x6e3   : > { %v3539_v15 = vpop.f32.mrb[11].mxu0 }
 0x6e4   : > { %v5252_v18 = vpop.f32.mrb[8].mxu1 }
 0x6e5   : > { %v1556_v19 = vpack.c.bf16 %v5252_v18, %v5250_v13  ;;  %v3544_v20 = vpop.f32.mrb[9].mxu1 }
 0x6e6   : > { %v1553_v21 = vpop.f32.mrb[10].mxu1 }
 0x6e7   : > { %v3545_v22 = vpop.f32.mrb[11].mxu1 }
 0x6e8   : > { %v1603_v23 = vpop.f32.mrb[12].mxu0 }
 0x6e9   : > { %v1661_v24 = vmul.f32 0.35355338, %v1603_v23  ;;  %v3550_v25 = vpop.f32.mrb[13].mxu0 }
 0x6ea   : > { %v1606_v28 = vpop.f32.mrb[14].mxu0 }
 0x6eb   : > { %v3551_v29 = vpop.f32.mrb[15].mxu0  ;;  %v1663_v30 = vadd.f32 %v1661_v24, %v5215_v31 }
 0x6ec   : > { %v1655_v32 = vpop.f32.mrb[12].mxu1 }
 0x6ed   : > { %v1662_v33 = vmul.f32 0.35355338, %v1655_v32  ;;  %v3556_v34 = vpop.f32.mrb[13].mxu1  ;;  %v1665_v35 = vsel %vm1342_vm2, %v1663_v30, -inf }
 0x6ee   : > { %v1658_v37 = vpop.f32.mrb[14].mxu1  ;;  %1666 = vmax.xlane.f32.xlu0 %v1665_v35 }
 0x6ef   : > { %v3557_v38 = vpop.f32.mrb[15].mxu1  ;;  %v1664_v39 = vadd.f32 %v1662_v33, %v5220_v36 }
 0x6f1   : > { %v1668_v40 = vsel %vm1342_vm2, %v1664_v39, -inf }
 0x6f2   : > { %1669 = vmax.xlane.f32.xlu1 %v1668_v40 }
 0x703   : > { %1739 = vrot.lane.b32.xlu1 %v5204_v27, %s4498_s0 }
 0x707   : > { %1884 = vrot.lane.b32.xlu1 %v5178_v10, %s4499_s22 }
 0x70b   : > { %1934 = vrot.lane.b32.xlu1 %v5180_v12, %s4499_s22 }
 0x70f   : > { %1932 = vrot.lane.b32.xlu1 %v5192_v17, %s4499_s22 }
 0x77b   : > { %v1667_v41 = vpop.xlane.xlu0 %1666 }
 0x77c   : > { %v1671_v42 = vsub.f32 %v1663_v30, %v1667_v41 }
 0x77e   : > { %v1673_v43 = vmul.f32 1.442695, %v1671_v42 }
 0x77f   : > { %v1670_v44 = vpop.xlane.xlu1 %1669 }
 0x780   : > { %3933 = vpow2.f32 %v1673_v43  ;;  %v1672_v45 = vsub.f32 %v1664_v39, %v1670_v44 }
 0x782   : > { %v1675_v46 = vmul.f32 1.442695, %v1672_v45 }
 0x783   : > { %v1740_v47 = vpop.permute.xlu1 %1739 }
 0x784   : > { %3935 = vpow2.f32 %v1675_v46  ;;  %v1745_v48 = vsel %vm1466_vm3, %v1740_v47, 0 }
 0x785   : > { %3565 = vmatpush3.bf16.msra.mxu1 %v1745_v48 }
 0x786   : > { %3576 = vmatprep.subr.bf16.mxu1 %v4495_v2 }
 0x787   : > { %v1885_v8 = vpop.permute.xlu1 %1884 }
 0x788   : > { %v1890_v23 = vsel %vm1342_vm2, %v1885_v8, 0 }
 0x78a   : > { %v3934_v49 = vpop.eup %3933 }
 0x78b   : > { %v1677_v50 = vsel %vm1342_vm2, %v3934_v49, 0.0  ;;  %v1935_v9 = vpop.permute.xlu1 %1934 }
 0x78c   : > { %1678 = vadd.xlane.f32.xlu0 %v1677_v50  ;;  %v1940_v11 = vsel %vm1342_vm2, %v1935_v9, 0 }
 0x78e   : > { %v3936_v51 = vpop.eup %3935 }
 0x78f   : > { %v1680_v52 = vsel %vm1342_vm2, %v3936_v51, 0.0  ;;  %v1933_v0 = vpop.permute.xlu1 %1932 }
 0x790   : > { %1681 = vadd.xlane.f32.xlu0 %v1680_v52 }
 0x7a6   : > { %1690 = vrot.lane.b32.xlu0 %v5202_v26, %s4498_s0 }
 0x7aa   : > { %1882 = vrot.lane.b32.xlu0 %v5190_v16, %s4499_s22 }
 0x819   : > { %v1679_v53 = vpop.xlane.xlu0 %1678 }
 0x81a   : > { %3937 = vrcp.f32 %v1679_v53 }
 0x81d   : > { %v1682_v56 = vpop.xlane.xlu0 %1681 }
 0x81e   : > { %3939 = vrcp.f32 %v1682_v56 }
 0x821   : > { %v1691_v57 = vpop.permute.xlu0 %1690 }
 0x822   : > { %v1696_v58 = vsel %vm1466_vm3, %v1691_v57, 0 }
 0x823   : > { %3559 = vmatpush3.bf16.msra.mxu0 %v1696_v58 }
 0x824   : > { %v3938_v59 = vpop.eup %3937  ;;  %3570 = vmatprep.subr.bf16.mxu0 %v4495_v2 }
 0x825   : > { %v1684_v61 = vmul.f32 %v3938_v59, %v3934_v49  ;;  %v1883_v29 = vpop.permute.xlu0 %1882 }
 0x827   : > { %v1687_v62 = vpack.c.bf16 %v1684_v61, %v1684_v61 }
 0x828   : > { %v3940_v1 = vpop.eup %3939 }
 0x829   : > { %v1686_v5 = vmul.f32 %v3940_v1, %v3936_v51  ;;  %3561 = vmatmul.mubr.msk.bf16.vlgmr.msra.gmra.mrb[16].mxu0 %vm1342_vm2, %v1687_v62 }
 0x82a   : > { %3571 = vmatpush3.bf16.msra.mxu0 %v1792_v63  ;;  %3572 = vmatprep.mubr.msk.bf16.mxu0 %vm4497_vm1, %v4495_v2 }
 0x82b   : > { %v1688_v6 = vpack.c.bf16 %v1686_v5, %v1686_v5  ;;  %3582 = vmatprep.subr.bf16.mxu0 %v4495_v2 }
 0x82d   : > { %3567 = vmatmul.mubr.msk.bf16.vlgmr.msra.gmra.mrb[16].mxu1 %vm1342_vm2, %v1688_v6 }
 0x82e   : > { %3577 = vmatpush3.bf16.msra.mxu1 %v1839_v7  ;;  %3578 = vmatprep.mubr.msk.bf16.mxu1 %vm4497_vm1, %v4495_v2 }
 0x82f   : > { %3588 = vmatprep.subr.bf16.mxu1 %v4495_v2 }
 0x835   : > { %3579 = vmatmul.mubr.msk.bf16.vlgmr.msra.gmra.mrb[20].mxu1 %vm1342_vm2, %v1556_v19 }
 0x836   : > { %3590 = vmatprep.mubr.msk.bf16.mxu1 %vm4497_vm1, %v4495_v2 }
 0x837   : > { %3589 = vmatpush3.bf16.xpose.msra.mxu1 %v1940_v11 }
 0x838   : > { %3600 = vmatprep.subr.bf16.mxu1 %v4495_v2 }
 0x83e   : > { %3591 = vmatmul.mubr.msk.bf16.vlgmr.msra.gmra.mrb[24].mxu1 %vm1342_vm2, %v1933_v0 }
 0x83f   : > { %3602 = vmatprep.mubr.msk.bf16.mxu1 %vm4497_vm1, %v4495_v2 }
 0x8fc   : > { %v1732_v14 = vpop.f32.mrb[16].mxu0 }
 0x8fd   : > { %v3562_v15 = vpop.f32.mrb[17].mxu0 }
 0x8fe   : > { %v1735_v20 = vpop.f32.mrb[18].mxu0 }
 0x8ff   : > { %v3563_v13 = vpop.f32.mrb[19].mxu0 }
 0x900   : > { %v1781_v18 = vpop.f32.mrb[16].mxu1 }
 0x901   : > { %v1787_v19 = vpack.c.bf16 %v1781_v18, %v1732_v14  ;;  %v3568_v21 = vpop.f32.mrb[17].mxu1 }
 0x902   : > { %v1784_v22 = vpop.f32.mrb[18].mxu1 }
 0x903   : > { %v3569_v24 = vpop.f32.mrb[19].mxu1  ;;  %3573 = vmatmul.mubr.msk.bf16.vlgmr.msra.gmra.mrb[20].mxu0 %vm1342_vm2, %v1787_v19 }
 0x904   : > { %3583 = vmatpush3.bf16.xpose.msra.mxu0 %v1890_v23  ;;  %3584 = vmatprep.mubr.msk.bf16.mxu0 %vm4497_vm1, %v4495_v2  ;;  %v1334_v23 = vld [vmem:[%s5079_s28 + $0x8] sm:$0xf] }
 0x905   : > { %3594 = vmatprep.subr.bf16.mxu0 %v4495_v2  ;;  %v2111_v24 = vsel %vm1466_vm3, %v1334_v23, 0 }
 0x908   : > { %v1875_v25 = vpop.f32.mrb[20].mxu1 }
 0x909   : > { %v3580_v28 = vpop.f32.mrb[21].mxu1 }
 0x90a   : > { %v1878_v30 = vpop.f32.mrb[22].mxu1 }
 0x90b   : > { %v3581_v32 = vpop.f32.mrb[23].mxu1  ;;  %3585 = vmatmul.mubr.msk.bf16.vlgmr.msra.gmra.mrb[24].mxu0 %vm1342_vm2, %v1883_v29 }
 0x90c   : > { %3596 = vmatprep.mubr.msk.bf16.mxu0 %vm4497_vm1, %v4495_v2 }
 0x911   : > { %v1976_v33 = vpop.f32.mrb[24].mxu1 }
 0x912   : > { %v1983_v34 = vmul.f32 0.35355338, %v1976_v33  ;;  %v3592_v35 = vpop.f32.mrb[25].mxu1 }
 0x913   : > { %v1979_v37 = vpop.f32.mrb[26].mxu1 }
 0x914   : > { %v3593_v38 = vpop.f32.mrb[27].mxu1  ;;  %v1985_v39 = vadd.f32 %v1983_v34, %v5220_v36 }
 0x916   : > { %v1989_v40 = vsel %vm1342_vm2, %v1985_v39, -inf }
 0x917   : > { %1990 = vmax.xlane.f32.xlu1 %v1989_v40 }
 0x928   : > { %2058 = vrot.lane.b32.xlu1 %v5204_v27, %s4499_s22 }
 0x92c   : > { %2158 = vrot.lane.b32.xlu1 %v5178_v10, %s4500_s29 }
 0x930   : > { %2208 = vrot.lane.b32.xlu1 %v5180_v12, %s4500_s29 }
 0x934   : > { %2206 = vrot.lane.b32.xlu1 %v5192_v17, %s4500_s29 }
 0x9a4   : > { %v1991_v41 = vpop.xlane.xlu1 %1990 }
 0x9a5   : > { %v1993_v44 = vsub.f32 %v1985_v39, %v1991_v41 }
 0x9a7   : > { %v1996_v45 = vmul.f32 1.442695, %v1993_v44 }
 0x9a8   : > { %v2059_v42 = vpop.permute.xlu1 %2058 }
 0x9a9   : > { %v2064_v43 = vsel %vm1466_vm3, %v2059_v42, 0  ;;  %3941 = vpow2.f32 %v1996_v45 }
 0x9aa   : > { %3601 = vmatpush3.bf16.msra.mxu1 %v2064_v43 }
 0x9ab   : > { %3612 = vmatprep.subr.bf16.mxu1 %v4495_v2 }
 0x9ac   : > { %v2159_v7 = vpop.permute.xlu1 %2158 }
 0x9ad   : > { %v2164_v9 = vsel %vm1342_vm2, %v2159_v7, 0 }
 0x9b0   : > { %v2209_v35 = vpop.permute.xlu1 %2208 }
 0x9b1   : > { %v2214_v41 = vsel %vm1342_vm2, %v2209_v35, 0 }
 0x9b3   : > { %v3942_v58 = vpop.eup %3941 }
 0x9b4   : > { %v2001_v59 = vsel %vm1342_vm2, %v3942_v58, 0.0 }
 0x9d6   : > { %v1828_v46 = vpop.f32.mrb[20].mxu0 }
 0x9d7   : > { %v5321_v47 = vadd.f32 %v1875_v25, %v1828_v46  ;;  %v3574_v48 = vpop.f32.mrb[21].mxu0 }
 0x9d8   : > { %v1831_v10 = vpop.f32.mrb[22].mxu0 }
 0x9d9   : > { %v5323_v49 = vadd.f32 %v1878_v30, %v1831_v10  ;;  %v3575_v12 = vpop.f32.mrb[23].mxu0 }
 0x9de   : > { %v1926_v50 = vpop.f32.mrb[24].mxu0 }
 0x9df   : > { %v1982_v17 = vmul.f32 0.35355338, %v1926_v50  ;;  %v3586_v51 = vpop.f32.mrb[25].mxu0 }
 0x9e0   : > { %v1929_v52 = vpop.f32.mrb[26].mxu0 }
 0x9e1   : > { %v3587_v53 = vpop.f32.mrb[27].mxu0  ;;  %v1984_v56 = vadd.f32 %v1982_v17, %v5215_v31 }
 0x9e3   : > { %v1986_v57 = vsel %vm1342_vm2, %v1984_v56, -inf }
 0x9e4   : > { %1987 = vmax.xlane.f32.xlu0 %v1986_v57 }
 0x9e8   : > { %2002 = vadd.xlane.f32.xlu0 %v2001_v59 }
 0xa71   : > { %v1988_v60 = vpop.xlane.xlu0 %1987 }
 0xa72   : > { %v1992_v61 = vsub.f32 %v1984_v56, %v1988_v60 }
 0xa74   : > { %v1994_v62 = vmul.f32 1.442695, %v1992_v61 }
 0xa75   : > { %v2003_v63 = vpop.xlane.xlu0 %2002 }
 0xa76   : > { %3943 = vpow2.f32 %v1994_v62 }
 0xa77   : > { %3945 = vrcp.f32 %v2003_v63 }
 0xa80   : > { %v3944_v1 = vpop.eup %3943 }
 0xa81   : > { %v3946_v4 = vpop.eup %3945  ;;  %v1998_v5 = vsel %vm1342_vm2, %v3944_v1, 0.0 }
 0xa82   : > { %v2007_v6 = vmul.f32 %v3946_v4, %v3942_v58  ;;  %1999 = vadd.xlane.f32.xlu0 %v1998_v5 }
 0xa84   : > { %v2009_v8 = vpack.c.bf16 %v2007_v6, %v2007_v6 }
 0xa86   : > { %3603 = vmatmul.mubr.msk.bf16.vlgmr.msra.gmra.mrb[28].mxu1 %vm1342_vm2, %v2009_v8 }
 0xa87   : > { %3613 = vmatpush3.bf16.xpose.msra.mxu1 %v2164_v9  ;;  %3614 = vmatprep.mubr.msk.bf16.mxu1 %vm4497_vm1, %v4495_v2 }
 0xa88   : > { %3624 = vmatprep.subr.bf16.mxu1 %v4495_v2 }
 0xa98   : > { %2010 = vrot.lane.b32.xlu0 %v5202_v26, %s4499_s22 }
 0xa9c   : > { %2156 = vrot.lane.b32.xlu0 %v5190_v16, %s4500_s29 }
 0xb0f   : > { %v2000_v11 = vpop.xlane.xlu0 %1999 }
 0xb10   : > { %3947 = vrcp.f32 %v2000_v11 }
 0xb13   : > { %v2011_v0 = vpop.permute.xlu0 %2010 }
 0xb14   : > { %v2016_v14 = vsel %vm1466_vm3, %v2011_v0, 0 }
 0xb15   : > { %3595 = vmatpush3.bf16.msra.mxu0 %v2016_v14 }
 0xb16   : > { %3606 = vmatprep.subr.bf16.mxu0 %v4495_v2 }
 0xb17   : > { %v2157_v15 = vpop.permute.xlu0 %2156 }
 0xb18   : > { %3615 = vmatmul.mubr.msk.bf16.vlgmr.msra.gmra.mrb[32].mxu1 %vm1342_vm2, %v2157_v15  ;;  %v1335_v15 = vld [vmem:[%s5079_s28 + $0xc] sm:$0xf] }
 0xb19   : > { %3626 = vmatprep.mubr.msk.bf16.mxu1 %vm4497_vm1, %v4495_v2 }
 0xb1a   : > { %v3948_v20 = vpop.eup %3947 }
 0xb1b   : > { %v2005_v13 = vmul.f32 %v3948_v20, %v3944_v1  ;;  %v2385_v20 = vsel %vm1466_vm3, %v1335_v15, 0  ;;  %v3922_v15 = vld [vmem:[%s5085_s18 + $0x28] sm:$0xff]  }
 0xb1d   : > { %v2008_v18 = vpack.c.bf16 %v2005_v13, %v2005_v13 }
 0xb1f   : > { %3597 = vmatmul.mubr.msk.bf16.vlgmr.msra.gmra.mrb[28].mxu0 %vm1342_vm2, %v2008_v18 }
 0xb20   : > { %3608 = vmatprep.mubr.msk.bf16.mxu0 %vm4497_vm1, %v4495_v2  ;;  %3607 = vmatpush3.bf16.msra.mxu0 %v2111_v24 }
 0xb21   : > { %3618 = vmatprep.subr.bf16.mxu0 %v4495_v2 }
 0xb59   : > { %v2100_v16 = vpop.f32.mrb[28].mxu1 }
 0xb5a   : > { %v3604_v19 = vpop.f32.mrb[29].mxu1 }
 0xb5b   : > { %v2103_v21 = vpop.f32.mrb[30].mxu1 }
 0xb5c   : > { %v3605_v22 = vpop.f32.mrb[31].mxu1 }
 0xbeb   : > { %v2200_v25 = vpop.f32.mrb[32].mxu1 }
 0xbec   : > { %v2256_v28 = vmul.f32 0.35355338, %v2200_v25  ;;  %v3616_v29 = vpop.f32.mrb[33].mxu1 }
 0xbed   : > { %v2203_v30 = vpop.f32.mrb[34].mxu1  ;;  %v3368_v29 = vld [vmem:[%s1006_s3] ss:$0 sm:$0xff] }
 0xbee   : > { %v3617_v32 = vpop.f32.mrb[35].mxu1  ;;  %v2258_v33 = vadd.f32 %v2256_v28, %v5215_v31  ;;  %v2207_v31 = vpop.permute.xlu1 %2206 }
 0xbf0   : > { %v2260_v34 = vsel %vm1342_vm2, %v2258_v33, -inf }
 0xbf1   : > { %2261 = vmax.xlane.f32.xlu0 %v2260_v34 }
 0xbf2   : > { %v2052_v37 = vpop.f32.mrb[28].mxu0 }
 0xbf3   : > { %v2106_v38 = vpack.c.bf16 %v2100_v16, %v2052_v37  ;;  %v3598_v39 = vpop.f32.mrb[29].mxu0 }
 0xbf4   : > { %v2055_v40 = vpop.f32.mrb[30].mxu0 }
 0xbf5   : > { %v3599_v42 = vpop.f32.mrb[31].mxu0  ;;  %3609 = vmatmul.mubr.msk.bf16.vlgmr.msra.gmra.mrb[32].mxu0 %vm1342_vm2, %v2106_v38 }
 0xbf6   : > { %3619 = vmatpush3.bf16.xpose.msra.mxu0 %v2214_v41  ;;  %3620 = vmatprep.mubr.msk.bf16.mxu0 %vm4497_vm1, %v4495_v2  ;;  %v3909_v41 = vld [vmem:[%s5082_s9] sm:$0xff]   ;;  %v3910_v42 = vld [vmem:[%s5082_s9 + $0x8] sm:$0xff]  }
 0xbf7   : > { %3630 = vmatprep.subr.bf16.mxu0 %v4495_v2 }
 0xbfd   : > { %3621 = vmatmul.mubr.msk.bf16.vlgmr.msra.gmra.mrb[36].mxu0 %vm1342_vm2, %v2207_v31 }
 0xbfe   : > { %3632 = vmatprep.mubr.msk.bf16.mxu0 %vm4497_vm1, %v4495_v2 }
 0xc7e   : > { %v2262_v43 = vpop.xlane.xlu0 %2261 }
 0xc7f   : > { %v2266_v44 = vsub.f32 %v2258_v33, %v2262_v43 }
 0xc81   : > { %v2268_v45 = vmul.f32 1.442695, %v2266_v44 }
 0xc83   : > { %3949 = vpow2.f32 %v2268_v45 }
 0xc8d   : > { %v3950_v46 = vpop.eup %3949 }
 0xc8e   : > { %v2272_v48 = vsel %vm1342_vm2, %v3950_v46, 0.0 }
 0xc8f   : > { %2273 = vadd.xlane.f32.xlu0 %v2272_v48 }
 0xcc8   : > { %v2147_v10 = vpop.f32.mrb[32].mxu0 }
 0xcc9   : > { %v2154_v12 = vadd.f32 %v2147_v10, %v5321_v47  ;;  %v3610_v50 = vpop.f32.mrb[33].mxu0 }
 0xcca   : > { %v2150_v17 = vpop.f32.mrb[34].mxu0  ;;  %v3911_v50 = vld [vmem:[%s5082_s9 + $0x10] sm:$0xff]  }
 0xccb   : > { %v2155_v51 = vadd.f32 %v2150_v17, %v5323_v49  ;;  %v3611_v52 = vpop.f32.mrb[35].mxu0  ;;  %v3912_v17 = vld [vmem:[%s5082_s9 + $0x18] sm:$0xff]  }
 0xccc   : > { %v3914_v52 = vld [vmem:[%s5082_s9 + $0x28] sm:$0xff]  }
 0xcd0   : > { %v2250_v53 = vpop.f32.mrb[36].mxu0 }
 0xcd1   : > { %v2257_v56 = vmul.f32 0.35355338, %v2250_v53  ;;  %v3622_v57 = vpop.f32.mrb[37].mxu0  ;;  %v3915_v53 = vld [vmem:[%s5082_s9 + $0x30] sm:$0xff]  }
 0xcd2   : > { %v2253_v58 = vpop.f32.mrb[38].mxu0 }
 0xcd3   : > { %v3623_v59 = vpop.f32.mrb[39].mxu0  ;;  %v2259_v60 = vadd.f32 %v2257_v56, %v5220_v36  ;;  %v3916_v56 = vld [vmem:[%s5082_s9 + $0x38] sm:$0xff]  }
 0xcd5   : > { %v2263_v61 = vsel %vm1342_vm2, %v2259_v60, -inf }
 0xcd6   : > { %2264 = vmax.xlane.f32.xlu1 %v2263_v61 }
 0xce7   : > { %2332 = vrot.lane.b32.xlu1 %v5204_v27, %s4500_s29 }
 0xd1c   : > { %v2274_v36 = vpop.xlane.xlu0 %2273 }
 0xd63   : > { %v2265_v62 = vpop.xlane.xlu1 %2264 }
 0xd64   : > { %v2267_v47 = vsub.f32 %v2259_v60, %v2265_v62 }
 0xd66   : > { %v2270_v63 = vmul.f32 1.442695, %v2267_v47 }
 0xd67   : > { %v2333_v1 = vpop.permute.xlu1 %2332 }
 0xd68   : > { %3951 = vpow2.f32 %v2270_v63  ;;  %v2338_v49 = vsel %vm1466_vm3, %v2333_v1, 0  ;;  %v3369_v63 = vld [vmem:[%s1009_s8] ss:$0 sm:$0xff] }
 0xd69   : > { %3631 = vmatpush3.bf16.msra.mxu0 %v2338_v49  ;;  %3953 = vrcp.f32 %v2274_v36  ;;  %v3370_v36 = vld [vmem:[%s839_s4] ss:$0 sm:$0xff]  ;;  %s5641_s4 = scalar_lea.vmem [#allocation14], %s5068_s27 }
 0xd6a   : > { %3642 = vmatprep.subr.bf16.mxu0 %v4495_v2 }
 0xd72   : > { %v3952_v4 = vpop.eup %3951 }
 0xd73   : > { %v2275_v5 = vsel %vm1342_vm2, %v3952_v4, 0.0  ;;  %v3954_v27 = vpop.eup %3953 }
 0xd74   : > { %2276 = vadd.xlane.f32.xlu0 %v2275_v5  ;;  %v2279_v7 = vmul.f32 %v3954_v27, %v3950_v46 }
 0xd76   : > { %v2282_v11 = vpack.c.bf16 %v2279_v7, %v2279_v7 }
 0xd8a   : > { %2284 = vrot.lane.b32.xlu0 %v5202_v26, %s4500_s29 }
 0xe01   : > { %v2277_v6 = vpop.xlane.xlu0 %2276 }
 0xe02   : > { %3955 = vrcp.f32 %v2277_v6 }
 0xe05   : > { %v2285_v8 = vpop.permute.xlu0 %2284 }
 0xe06   : > { %v2290_v9 = vsel %vm1466_vm3, %v2285_v8, 0 }
 0xe07   : > { %3625 = vmatpush3.bf16.msra.mxu1 %v2290_v9  ;;  %v3917_v9 = vld [vmem:[%s5085_s18] sm:$0xff]  }
 0xe08   : > { %3636 = vmatprep.subr.bf16.mxu1 %v4495_v2 }
 0xe0a   : > { %3627 = vmatmul.mubr.msk.bf16.vlgmr.msra.gmra.mrb[36].mxu1 %vm1342_vm2, %v2282_v11  ;;  %v3918_v11 = vld [vmem:[%s5085_s18 + $0x8] sm:$0xff]  }
 0xe0b   : > { %3638 = vmatprep.mubr.msk.bf16.mxu1 %vm4497_vm1, %v4495_v2  ;;  %3637 = vmatpush3.bf16.msra.mxu1 %v2385_v20  ;;  %v3923_v20 = vld [vmem:[%s5085_s18 + $0x30] sm:$0xff]  }
 0xe0c   : > { %v3956_v26 = vpop.eup %3955  ;;  %3662 = vmatprep.subr.bf16.mxu1 %v4495_v2 }
 0xe0d   : > { %v2281_v0 = vmul.f32 %v3956_v26, %v3952_v4  ;;  %v3919_v26 = vld [vmem:[%s5085_s18 + $0x10] sm:$0xff]  }
 0xe0f   : > { %v2283_v14 = vpack.c.bf16 %v2281_v0, %v2281_v0  ;;  %v3920_v0 = vld [vmem:[%s5085_s18 + $0x18] sm:$0xff]  }
 0xe11   : > { %3633 = vmatmul.mubr.msk.bf16.vlgmr.msra.gmra.mrb[40].mxu0 %vm1342_vm2, %v2283_v14  ;;  %v3921_v14 = vld [vmem:[%s5085_s18 + $0x20] sm:$0xff]  }
 0xe12   : > { %3658 = vmatprep.mubr.msk.bf16.mxu0 %vm4497_vm1, %v4495_v2  ;;  %3643 = vmatpush3.bf16.msra.mxu0 %v3909_v41 }
 0xe13   : > { %3644 = vmatprep.subr.bf16.mxu0 %v4495_v2 }
 0xe16   : > { %3645 = vmatpush3.bf16.msra.mxu0 %v3910_v42 }
 0xe17   : > { %3646 = vmatprep.subr.bf16.mxu0 %v4495_v2 }
 0xe1a   : > { %3647 = vmatpush3.bf16.msra.mxu0 %v3911_v50 }
 0xe1b   : > { %3648 = vmatprep.subr.bf16.mxu0 %v4495_v2 }
 0xe1e   : > { %3649 = vmatpush3.bf16.msra.mxu0 %v3912_v17 }
 0xe1f   : > { %3650 = vmatprep.subr.bf16.mxu0 %v4495_v2 }
 0xedd   : > { %v2326_v13 = vpop.f32.mrb[36].mxu1 }
 0xede   : > { %v3628_v18 = vpop.f32.mrb[37].mxu1 }
 0xedf   : > { %v2329_v16 = vpop.f32.mrb[38].mxu1  ;;  %v3371_v18 = vld [vmem:[%s856_s1] ss:$0 sm:$0xff]  ;;  %s5643_s1 = scalar_lea.vmem [#allocation16], %s5068_s27 }
 0xee0   : > { %v3629_v19 = vpop.f32.mrb[39].mxu1 }
 0xee4   : > { %v2374_v21 = vpop.f32.mrb[40].mxu0 }
 0xee5   : > { %v2380_v22 = vpack.c.bf16 %v2374_v21, %v2326_v13  ;;  %v3634_v23 = vpop.f32.mrb[41].mxu0  ;;  %v3924_v13 = vld [vmem:[%s5085_s18 + $0x38] sm:$0xff]   ;;  %s5644_s18 = sld [smem:[#allocation30_spill]] }
 0xee6   : > { %v2377_v24 = vpop.f32.mrb[42].mxu0 }
 0xee7   : > { %v3635_v25 = vpop.f32.mrb[43].mxu0  ;;  %3639 = vmatmul.mubr.msk.bf16.vlgmr.msra.gmra.mrb[40].mxu1 %vm1342_vm2, %v2380_v22 }
 0xee8   : > { %3678 = vmatprep.mubr.msk.bf16.mxu1 %vm4497_vm1, %v4495_v2  ;;  %3663 = vmatpush3.bf16.msra.mxu1 %v3917_v9 }
 0xee9   : > { %3664 = vmatprep.subr.bf16.mxu1 %v4495_v2 }
 0xeeb   : > { %p3391_p2 = scmp.ne.s32.totalorder %s5644_s18, 1 }
 0xeec   : > { %3665 = vmatpush3.bf16.msra.mxu1 %v3918_v11  ;;  %vm4502_vm4 = vmmov (!%p3391_p2), 0   ;;  %s5645_s8 = sld [smem:[#allocation46_spill]] (!%p3391_p2)  ;;  %vm2780_vm5 = vcmask (!%p3391_p2), 1040384  }
 0xeed   : > { %3666 = vmatprep.subr.bf16.mxu1 %v4495_v2 }
 0xef0   : > { %3667 = vmatpush3.bf16.msra.mxu1 %v3919_v26 }
 0xef1   : > { %3668 = vmatprep.subr.bf16.mxu1 %v4495_v2 }
 0xef4   : > { %3669 = vmatpush3.bf16.msra.mxu1 %v3920_v0 }
 0xef5   : > { %3670 = vmatprep.subr.bf16.mxu1 %v4495_v2 }
 0xef8   : > { %3671 = vmatpush3.bf16.msra.mxu1 %v3921_v14 }
 0xef9   : > { %3672 = vmatprep.subr.bf16.mxu1 %v4495_v2 }
 0xefc   : > { %3673 = vmatpush3.bf16.msra.mxu1 %v3922_v15  ;;  %v3969_v15 = vld [vmem:[#allocation17] sm:$0xff] (!%p3391_p2)  }
 0xefd   : > { %3674 = vmatprep.subr.bf16.mxu1 %v4495_v2 }
 0xf00   : > { %3675 = vmatpush3.bf16.msra.mxu1 %v3923_v20  ;;  %v4501_v20 = vmov (!%p3391_p2), 0.0  }
 0xf01   : > { %3676 = vmatprep.subr.bf16.mxu1 %v4495_v2 }
 0xf04   : > { %3677 = vmatpush3.bf16.msra.mxu1 %v3924_v13  ;;  %v3970_v13 = vld [vmem:[#allocation17 + $0x8] sm:$0xff] (!%p3391_p2)  }
 0xf05   : > { %3702 = vmatprep.subr.bf16.mxu1 (!%p3391_p2), %v4501_v20 }
 0xfba   : > { %v2421_v28 = vpop.f32.mrb[40].mxu1 }
 0xfbb   : > { %v2428_v30 = vadd.f32 %v2421_v28, %v2154_v12  ;;  %v3640_v32 = vpop.f32.mrb[41].mxu1 }
 0xfbc   : > { %v2424_v33 = vpop.f32.mrb[42].mxu1 }
 0xfbd   : > { %v2437_v34 = vadd.f32 %v3368_v29, %v2428_v30  ;;  %v2429_v35 = vadd.f32 %v2424_v33, %v2155_v51  ;;  %v3641_v37 = vpop.f32.mrb[43].mxu1  ;;  %v3913_v51 = vld [vmem:[%s5082_s9 + $0x20] sm:$0xff]   ;;  %s5642_s9 = scalar_lea.vmem [#allocation15], %s5068_s27 }
 0xfbe   : > { %3651 = vmatpush3.bf16.msra.mxu0 %v3913_v51 }
 0xfbf   : > { %v2438_v38 = vadd.f32 %v3368_v29, %v2429_v35  ;;  %v2439_v39 = vadd.f32 %v2437_v34, %v5155_v54  ;;  %3652 = vmatprep.subr.bf16.mxu0 %v4495_v2 }
 0xfc1   : > { %2443 = vadd.xlane.f32.xlu1 %v2439_v39  ;;  %v2440_v40 = vadd.f32 %v2438_v38, %v5157_v55 }
 0xfc2   : > { %3653 = vmatpush3.bf16.msra.mxu0 %v3914_v52 }
 0xfc3   : > { %2445 = vadd.xlane.f32.xlu0 %v2440_v40  ;;  %3654 = vmatprep.subr.bf16.mxu0 %v4495_v2 }
 0xfc6   : > { %3655 = vmatpush3.bf16.msra.mxu0 %v3915_v53 }
 0xfc7   : > { %3656 = vmatprep.subr.bf16.mxu0 %v4495_v2 }
 0xfca   : > { %3657 = vmatpush3.bf16.msra.mxu0 %v3916_v56 }
 0xfcb   : > { %3682 = vmatprep.subr.bf16.mxu0 (!%p3391_p2), %v4501_v20 }
0x104e   : > { %v2444_v31 = vpop.xlane.xlu1 %2443 }
0x104f   : > { %v2447_v43 = vmul.f32 0.03125, %v2444_v31 }
0x1050   : > { %v2446_v44 = vpop.xlane.xlu0 %2445 }
0x1051   : > { %v2449_v45 = vsub.f32 %v2439_v39, %v2447_v43  ;;  %v2448_v54 = vmul.f32 0.03125, %v2446_v44 }
0x1053   : > { %v2451_v46 = vmul.f32 %v5113_v3, %v2449_v45  ;;  %v2450_v55 = vsub.f32 %v2440_v40, %v2448_v54  ;;  %v3380_v54 = vld [vmem:[%s5641_s4] ss:$0 sm:$0xff] }
0x1055   : > { %v2452_v48 = vmul.f32 %v5113_v3, %v2450_v55  ;;  %v2453_v10 = vmul.f32 %v2451_v46, %v2451_v46 }
0x1057   : > { %2455 = vadd.xlane.f32.xlu0 %v2453_v10  ;;  %v2454_v12 = vmul.f32 %v2452_v48, %v2452_v48 }
0x1059   : > { %2457 = vadd.xlane.f32.xlu1 %v2454_v12 }
0x10e4   : > { %v2456_v57 = vpop.xlane.xlu0 %2455 }
0x10e5   : > { %v2459_v58 = vmul.f32 0.03125, %v2456_v57 }
0x10e6   : > { %v2458_v59 = vpop.xlane.xlu1 %2457 }
0x10e7   : > { %v2461_v60 = vadd.f32 1e-12, %v2459_v58  ;;  %v2460_v61 = vmul.f32 0.03125, %v2458_v59 }
0x10e9   : > { %3957 = vrsqrt.f32 %v2461_v60  ;;  %v2462_v62 = vadd.f32 1e-12, %v2460_v61 }
0x10eb   : > { %3959 = vrsqrt.f32 %v2462_v62 }
0x10f3   : > { %v3958_v47 = vpop.eup %3957 }
0x10f4   : > { %v2465_v1 = vmul.f32 %v3958_v47, %v2451_v46 }
0x10f5   : > { %v3960_v49 = vpop.eup %3959 }
0x10f6   : > { %v2466_v4 = vmul.f32 %v3960_v49, %v2452_v48  ;;  %v2473_v5 = vmul.f32 %v3369_v63, %v2465_v1 }
0x10f8   : > { %v2474_v27 = vmul.f32 %v3369_v63, %v2466_v4  ;;  %v5416_v6 = vadd.f32 %v3370_v36, %v2473_v5 }
0x10fa   : > { %v5418_v7 = vadd.f32 %v3370_v36, %v2474_v27 }
0x10fc   : > { %v2483_v8 = vpack.c.bf16 %v5418_v7, %v5416_v6 }
0x10fe   : > { %3659 = vmatmul.mubr.bf16.vlgmr.msra.gmra.mrb[44].mxu0 %v2483_v8 }
0x10ff   : > { %3683 = vmatpush3.bf16.msra.mxu0 (!%p3391_p2), %v3969_v15  ;;  %3698 = vmatprep.mubr.msk.bf16.mxu0 (!%p3391_p2), %vm4502_vm4, %v4501_v20 }
0x1100   : > { %3684 = vmatprep.subr.bf16.mxu0 (!%p3391_p2), %v4501_v20 }
0x1103   : > { %3685 = vmatpush3.bf16.msra.mxu0 (!%p3391_p2), %v3970_v13 }
0x1104   : > { %3686 = vmatprep.subr.bf16.mxu0 (!%p3391_p2), %v4501_v20 }
0x11d1   : > { %v2589_v16 = vpop.f32.mrb[44].mxu0 }
0x11d2   : > { %v2590_v19 = vadd.f32 %v3371_v18, %v2589_v16  ;;  %v3660_v21 = vpop.f32.mrb[45].mxu0  ;;  %v3977_v16 = vld [vmem:[%s5645_s8] sm:$0xff] (!%p3391_p2)  }
0x11d3   : > { %v2592_v22 = vpop.f32.mrb[46].mxu0  ;;  %v3978_v21 = vld [vmem:[%s5645_s8 + $0x8] sm:$0xff] (!%p3391_p2)  }
0x11d4   : > { %v2598_v23 = vmul.f32 0.044715, %v2590_v19  ;;  %v2593_v24 = vadd.f32 %v3371_v18, %v2592_v22  ;;  %v3661_v25 = vpop.f32.mrb[47].mxu0  ;;  %v2596_v41 = vmul.f32 0.5, %v2590_v19  ;;  %v3971_v18 = vld [vmem:[#allocation17 + $0x10] sm:$0xff] (!%p3391_p2)   ;;  %v3973_v22 = vld [vmem:[#allocation17 + $0x20] sm:$0xff] (!%p3391_p2)  }
0x11d5   : > { %3687 = vmatpush3.bf16.msra.mxu0 (!%p3391_p2), %v3971_v18  ;;  %v3980_v25 = vld [vmem:[%s5645_s8 + $0x18] sm:$0xff] (!%p3391_p2)  }
0x11d6   : > { %v2600_v28 = vmul.f32 %v2598_v23, %v2590_v19  ;;  %v2599_v29 = vmul.f32 0.044715, %v2593_v24  ;;  %v2597_v42 = vmul.f32 0.5, %v2593_v24  ;;  %3688 = vmatprep.subr.bf16.mxu0 (!%p3391_p2), %v4501_v20  ;;  %v3979_v23 = vld [vmem:[%s5645_s8 + $0x10] sm:$0xff] (!%p3391_p2)  }
0x11d8   : > { %v2602_v30 = vmul.f32 %v2600_v28, %v2590_v19  ;;  %v2601_v32 = vmul.f32 %v2599_v29, %v2593_v24  ;;  %v3975_v28 = vld [vmem:[#allocation17 + $0x30] sm:$0xff] (!%p3391_p2)  }
0x11da   : > { %v2604_v33 = vadd.f32 %v2602_v30, %v2590_v19  ;;  %v2603_v34 = vmul.f32 %v2601_v32, %v2593_v24  ;;  %v3972_v19 = vld [vmem:[#allocation17 + $0x18] sm:$0xff] (!%p3391_p2)  }
0x11db   : > { %3689 = vmatpush3.bf16.msra.mxu0 (!%p3391_p2), %v3972_v19  ;;  %v3976_v30 = vld [vmem:[#allocation17 + $0x38] sm:$0xff] (!%p3391_p2)  }
0x11dc   : > { %v2606_v35 = vmul.f32 0.7978846, %v2604_v33  ;;  %v2605_v37 = vadd.f32 %v2603_v34, %v2593_v24  ;;  %3690 = vmatprep.subr.bf16.mxu0 (!%p3391_p2), %v4501_v20  ;;  %v3974_v24 = vld [vmem:[#allocation17 + $0x28] sm:$0xff] (!%p3391_p2)   ;;  %v3981_v34 = vld [vmem:[%s5645_s8 + $0x20] sm:$0xff] (!%p3391_p2)  }
0x11de   : > { %3961 = vtanh.f32 %v2606_v35  ;;  %v2607_v2 = vmul.f32 0.7978846, %v2605_v37  ;;  %v3982_v35 = vld [vmem:[%s5645_s8 + $0x28] sm:$0xff] (!%p3391_p2)   ;;  %v3983_v37 = vld [vmem:[%s5645_s8 + $0x30] sm:$0xff] (!%p3391_p2)  }
0x11df   : > { %3691 = vmatpush3.bf16.msra.mxu0 (!%p3391_p2), %v3973_v22 }
0x11e0   : > { %3963 = vtanh.f32 %v2607_v2  ;;  %3692 = vmatprep.subr.bf16.mxu0 (!%p3391_p2), %v4501_v20  ;;  %v3984_v2 = vld [vmem:[%s5645_s8 + $0x38] sm:$0xff] (!%p3391_p2)  }
0x11e3   : > { %3693 = vmatpush3.bf16.msra.mxu0 (!%p3391_p2), %v3974_v24 }
0x11e4   : > { %3694 = vmatprep.subr.bf16.mxu0 (!%p3391_p2), %v4501_v20 }
0x11e7   : > { %3695 = vmatpush3.bf16.msra.mxu0 (!%p3391_p2), %v3975_v28 }
0x11e8   : > { %v3962_v38 = vpop.eup %3961  ;;  %3696 = vmatprep.subr.bf16.mxu0 (!%p3391_p2), %v4501_v20 }
0x11e9   : > { %v2610_v39 = vadd.f32 1.0, %v3962_v38  ;;  %v3392_v38 = vld [vmem:[#allocation18] ss:$0 sm:$0xff] (!%p3391_p2) }
0x11ea   : > { %v3964_v40 = vpop.eup %3963 }
0x11eb   : > { %v2611_v31 = vadd.f32 1.0, %v3964_v40  ;;  %v2612_v43 = vmul.f32 %v2610_v39, %v2596_v41  ;;  %3697 = vmatpush3.bf16.msra.mxu0 (!%p3391_p2), %v3976_v30 }
0x11ed   : > { %v2613_v44 = vmul.f32 %v2611_v31, %v2597_v42 }
0x11ef   : > { %v2614_v45 = vpack.c.bf16 %v2613_v44, %v2612_v43 }
0x11f1   : > { %3679 = vmatmul.mubr.bf16.vlgmr.msra.gmra.mrb[44].mxu1 %v2614_v45  ;;  %v3401_v45 = vld [vmem:[#allocation20] ss:$0 sm:$0xff] (!%p3391_p2) }
0x11f2   : > { %3718 = vmatprep.mubr.msk.bf16.mxu1 (!%p3391_p2), %vm4502_vm4, %v4501_v20  ;;  %3703 = vmatpush3.bf16.msra.mxu1 (!%p3391_p2), %v3977_v16 }
0x11f3   : > { %3704 = vmatprep.subr.bf16.mxu1 (!%p3391_p2), %v4501_v20 }
0x11f6   : > { %3705 = vmatpush3.bf16.msra.mxu1 (!%p3391_p2), %v3978_v21 }
0x11f7   : > { %3706 = vmatprep.subr.bf16.mxu1 (!%p3391_p2), %v4501_v20 }
0x11fa   : > { %3707 = vmatpush3.bf16.msra.mxu1 (!%p3391_p2), %v3979_v23 }
0x11fb   : > { %3708 = vmatprep.subr.bf16.mxu1 (!%p3391_p2), %v4501_v20 }
0x11fe   : > { %3709 = vmatpush3.bf16.msra.mxu1 (!%p3391_p2), %v3980_v25 }
0x11ff   : > { %3710 = vmatprep.subr.bf16.mxu1 (!%p3391_p2), %v4501_v20 }
0x1202   : > { %3711 = vmatpush3.bf16.msra.mxu1 (!%p3391_p2), %v3981_v34 }
0x1203   : > { %3712 = vmatprep.subr.bf16.mxu1 (!%p3391_p2), %v4501_v20 }
0x1206   : > { %3713 = vmatpush3.bf16.msra.mxu1 (!%p3391_p2), %v3982_v35 }
0x1207   : > { %3714 = vmatprep.subr.bf16.mxu1 (!%p3391_p2), %v4501_v20 }
0x120a   : > { %3715 = vmatpush3.bf16.msra.mxu1 (!%p3391_p2), %v3983_v37 }
0x120b   : > { %3716 = vmatprep.subr.bf16.mxu1 (!%p3391_p2), %v4501_v20 }
0x120e   : > { %3717 = vmatpush3.bf16.msra.mxu1 (!%p3391_p2), %v3984_v2 }
0x12c4   : > { %v2720_v46 = vpop.f32.mrb[44].mxu1 }
0x12c5   : > { %v2721_v55 = vadd.f32 %v3380_v54, %v2720_v46  ;;  %v3680_v48 = vpop.f32.mrb[45].mxu1 }
0x12c6   : > { %v2723_v10 = vpop.f32.mrb[46].mxu1 }
0x12c7   : > { %v2724_v12 = vadd.f32 %v3380_v54, %v2723_v10  ;;  %v3681_v50 = vpop.f32.mrb[47].mxu1  ;;  %v2727_v17 = vadd.f32 %v2721_v55, %v5416_v6  ;;  %v3389_v6 = vld [vmem:[%s5642_s9] ss:$0 sm:$0xff] }
0x12c9   : > { %2731 = vadd.xlane.f32.xlu0 %v2727_v17  ;;  %v2728_v51 = vadd.f32 %v2724_v12, %v5418_v7 }
0x12cb   : > { %2733 = vadd.xlane.f32.xlu1 %v2728_v51 }
0x1356   : > { %v2732_v52 = vpop.xlane.xlu0 %2731 }
0x1357   : > { %v2735_v53 = vmul.f32 0.03125, %v2732_v52 }
0x1358   : > { %v2734_v56 = vpop.xlane.xlu1 %2733 }
0x1359   : > { %v2737_v57 = vsub.f32 %v2727_v17, %v2735_v53  ;;  %v2736_v58 = vmul.f32 0.03125, %v2734_v56 }
0x135b   : > { %v2739_v59 = vmul.f32 %v5113_v3, %v2737_v57  ;;  %v2738_v60 = vsub.f32 %v2728_v51, %v2736_v58 }
0x135d   : > { %v2740_v61 = vmul.f32 %v5113_v3, %v2738_v60  ;;  %v2741_v62 = vmul.f32 %v2739_v59, %v2739_v59  ;;  %v3390_v3 = vld [vmem:[%s5643_s1] ss:$0 sm:$0xff] }
0x135f   : > { %2743 = vadd.xlane.f32.xlu0 %v2741_v62  ;;  %v2742_v47 = vmul.f32 %v2740_v61, %v2740_v61 }
0x1361   : > { %2745 = vadd.xlane.f32.xlu1 %v2742_v47 }
0x13ec   : > { %v2744_v63 = vpop.xlane.xlu0 %2743 }
0x13ed   : > { %v2747_v1 = vmul.f32 0.03125, %v2744_v63 }
0x13ee   : > { %v2746_v49 = vpop.xlane.xlu1 %2745 }
0x13ef   : > { %v2749_v4 = vadd.f32 1e-12, %v2747_v1  ;;  %v2748_v5 = vmul.f32 0.03125, %v2746_v49 }
0x13f1   : > { %3965 = vrsqrt.f32 %v2749_v4  ;;  %v2750_v36 = vadd.f32 1e-12, %v2748_v5 }
0x13f3   : > { %3967 = vrsqrt.f32 %v2750_v36 }
0x13fb   : > { %v3966_v27 = vpop.eup %3965 }
0x13fc   : > { %v2753_v7 = vmul.f32 %v3966_v27, %v2739_v59 }
0x13fd   : > { %v3968_v8 = vpop.eup %3967 }
0x13fe   : > { %v2761_v9 = vmul.f32 %v3389_v6, %v2753_v7  ;;  %v2754_v11 = vmul.f32 %v3968_v8, %v2740_v61  ;;  %2776 = sbr.rel (%p3391_p2) target bundleno = 5571 (0x15c3), region = 164 }
0x1400   : > { %v2769_v26 = vadd.f32 %v3390_v3, %v2761_v9  ;;  %v2762_v0 = vmul.f32 %v3389_v6, %v2754_v11 }
0x1402   : > { %2771 = vst [vmem:[#allocation2] sm:$0xff] %v2769_v26  ;;  %v2770_v14 = vadd.f32 %v3390_v3, %v2762_v0 }
0x1404   : > { %2772 = vst [vmem:[#allocation2 + $0x8] sm:$0xff] %v2770_v14  ;;  %v2778_v29 = vrot.slane (!%p3391_p2), %v2770_v14, 7 }
0x1406   : > { %v2781_v32 = vsel %vm2780_vm5, %v2769_v26, %v2778_v29 }
0x1407   : > { %v2782_v33 = vpack.c.bf16 %v2781_v32, %v2781_v32 }
0x1409   : > { %3699 = vmatmul.mubr.bf16.vlgmr.msra.gmra.mrb[0].mxu0 %v2782_v33 }
0x14dc   : > { %v2888_v39 = vpop.f32.mrb[0].mxu0 }
0x14dd   : > { %v2889_v40 = vadd.f32 %v3392_v38, %v2888_v39  ;;  %v3700_v41 = vpop.f32.mrb[1].mxu0 }
0x14de   : > { %v2891_v42 = vpop.f32.mrb[2].mxu0 }
0x14df   : > { %3985 = vtanh.f32 %v2889_v40  ;;  %v3701_v31 = vpop.f32.mrb[3].mxu0 }
0x14e9   : > { %v3986_v43 = vpop.eup %3985 }
0x14ea   : > { %v2895_v44 = vpack.c.bf16 %v3986_v43, %v3986_v43 }
0x14ec   : > { %3719 = vmatmul.mubr.bf16.vlgmr.msra.gmra.mrb[0].mxu1 %v2895_v44 }
0x15bf   : > { %v3001_v54 = vpop.f32.mrb[0].mxu1 }
0x15c0   : > { %v3002_v46 = vadd.f32 %v3401_v45, %v3001_v54  ;;  %v3720_v55 = vpop.f32.mrb[1].mxu1 }
0x15c1   : > { %v3004_v48 = vpop.f32.mrb[2].mxu1 }
0x15c2   : > { %3007 = vst [vmem:[#allocation21] sm:$0x3] %v3002_v46  ;;  %v3721_v10 = vpop.f32.mrb[3].mxu1 }
0x15c3 PF: > { %s5646_s4 = sld [smem:[#allocation30_spill]]  ;;  %s4503_s9 = smov [#allocation21]  }
0x15c4   : > { %s3015_s1 = sshll.u32 %s4503_s9, 4  ;;  %s3016_s1 = int_to_ptr.vmem [resolvable:$true] %s3015_s1 }
0x15c5   : > { %s4397_s18 = scalar_lea.vmem %s3016_s1, 32  ;;  %p4404_p5 = scmp.lt.s32.totalorder %s3016_s1, %s3016_s1 }
0x15c6   : > { %p4398_p12 = scmp.ne.s32.totalorder %s3016_s1, %s4397_s18  ;;  %p4405_p0 = scmp.lt.s32.totalorder %s4397_s18, %s4397_s18 }
0x15c8   : > { %p4406_p8 = por %p4405_p0, %p4404_p5 }
0x15c9   : > { %p3823_p11 = scmp.eq.s32.totalorder %s5646_s4, 1 }
0x15cb   : > { %p4399_p6 = pnand %p4398_p12, %p3823_p11 }
0x15cd   : > { %p4400_p7 = pneg %p4399_p6 }
0x15cf   : > { %p4407_p1 = pnand %p4406_p8, %p4400_p7 }
0x15d1   : > { %4410 = shalt.err (!%p4407_p1)
}
0x15d2   : > { %s5647_s10 = sld [smem:[#allocation47_spill]] }
0x15d8   : > { %s4411_s0 = scalar_lea.hbm %s5647_s10, 32 }
0x15d9   : > { %p4412_p9 = scmp.ne.s32.totalorder %s5647_s10, %s4411_s0  ;;  %p4417_p10 = scmp.lt.u32.totalorder %s4411_s0, %s5647_s10 }
0x15db   : > { %p4413_p13 = pnand %p4412_p9, %p3823_p11 }
0x15dd   : > { %p4414_p3 = pneg %p4413_p13 }
0x15df   : > { %p4419_p4 = pnand %p4417_p10, %p4414_p3 }
0x15e1   : > { %4422 = shalt.err (!%p4419_p4)
}
0x15e2   : > { %3765 = dma.vmem_to_hbm [thread:$0]  (%p3823_p11), %s3016_s1, 32, %s5647_s10, [#allocation5]  }
0x15e3   : > { %4460 = dma.done.wait (%p3823_p11), [#allocation5], 32  }
0x15e4   : > { %4462 = vsyncadd (%p3823_p11), [#allocation5], 4294967264 }
0x15e5 PF: > { %s5648_s24 = sld [smem:[#allocation31_spill]]  ;;  %s5649_s1 = sld [smem:[#allocation28_spill]] }
0x15e6   : > { %s5650_s22 = sld [smem:[#allocation29_spill]]  ;;  %s5651_s23 = sld [smem:[#allocation32_spill]] }
0x15eb   : > { %p31_p2 = scmp.ge.s32.totalorder %s5648_s24, 4  }
0x15ed   :  { %33 = sbr.rel (!%p31_p2) target bundleno = 20 (0x14), region = 261 }
0x15f4   :  { %3028 = vsyncpa [#allocation4], 1 }
0x15f5   :  { %3030 = vsyncpa [#allocation4 + $0x1], 1 }
0x15f6   :  { %3031 = vsyncpa [#allocation7], 1 }
0x15f7   :  { %3032 = vsyncpa [#allocation19], 1 }
0x15f8   :  { %3033 = vsyncpa [#allocation5], 1 }
0x15f9   :  { %3035 = vsyncpa [#allocation5 + $0x1], 1 }

</bundles_post_ra>
